<compile_context>
chip_gen: v6e
topology: v6e:2x2x1
jax: 0.10.0
libtpu: 0.0.40
codegen_flags: <defaults>
</compile_context>

<pallas_src>
import functools

import jax
import jax.numpy as jnp
from jax import lax
from jax.experimental import pallas as pl
from jax.experimental.pallas import tpu as pltpu


# dot_general dimension numbers for 2-D operands.
_NN = (((1,), (0,)), ((), ()))   # standard:       (m,k) @ (k,n) -> (m,n)
_NT = (((1,), (1,)), ((), ()))   # rhs-transposed: (m,k) @ (n,k) -> (m,n)
_TN = (((0,), (0,)), ((), ()))   # lhs-transposed: (k,m) @ (k,n) -> (m,n)


def _mm(a, b, dims, compute_dtype):
    if compute_dtype is not None:
        a = a.astype(compute_dtype)
        b = b.astype(compute_dtype)
    return lax.dot_general(a, b, dims, preferred_element_type=jnp.float32)


def _attention_kernel(x_cs_ref, wq_ref, bq_ref, wkv_ref, bkv_ref, wo_ref, bo_ref,
                      out_ref, *, hidden_size, q_tile, compute_dtype):
    H = hidden_size
    TQ = q_tile
    B = x_cs_ref.shape[0]
    q0 = pl.multiple_of(pl.program_id(0) * TQ, TQ)

    wq = wq_ref[...]        # (H, C)   -- 1/sqrt(H) scale folded in
    bq = bq_ref[...]        # (H, 1)
    wkv = wkv_ref[...]      # (2H, C)
    bkv = bkv_ref[...]      # (2H, 1)
    wo = wo_ref[...]        # (C, H)
    bo = bo_ref[...]        # (C, 1)

    # Batch is folded into this single grid step: static unroll over B keeps
    # the weights resident and amortizes the per-step pipeline overhead.
    for b in range(B):
        x_b = x_cs_ref[b]                                   # (C, S)  full keys
        xq = x_cs_ref[b, :, pl.ds(q0, TQ)]                  # (C, TQ) query tile

        # Channel-major projections (standard MXU matmuls, K = C padded anyway).
        q_t = _mm(wq, xq, _NN, compute_dtype) + bq          # (H, TQ)
        kv_t = _mm(wkv, x_b, _NN, compute_dtype) + bkv      # (2H, S)
        k_t = kv_t[:H]                                       # (H, S) sublane-aligned
        v_t = kv_t[H:]                                       # (H, S) sublane-aligned

        # scores[i, j] = q[:, i] . k[:, j]  (TN dot, flash-bwd pattern)
        s = _mm(q_t, k_t, _TN, compute_dtype)                # (TQ, S) f32

        # Softmax with deferred normalization (full key axis present -> exact).
        m = jnp.max(s, axis=-1, keepdims=True)
        p = jnp.exp(s - m)                                   # (TQ, S)
        denom = jnp.sum(p, axis=-1, keepdims=True)           # (TQ, 1)

        attn = _mm(p, v_t, _NT, compute_dtype)               # (TQ, H) unnormalized
        r = pl.reciprocal(denom, approx=True)                # EUP slot (cheap)
        r = r * (2.0 - denom * r)                            # one Newton step
        attn = attn * r

        # Output projection emitted directly channel-major; bias + residual fused.
        out_cs = _mm(wo, attn, _NT, compute_dtype)           # (C, TQ)
        out_ref[b] = (out_cs + bo + xq).astype(out_ref.dtype)


def attention_forward(x, params, hidden_size, *, compute_dtype=None):
    """x: (B, C, H, W) NCHW, as in the PyTorch module.

    compute_dtype: set to jnp.bfloat16 on v6e/v7x at production sizes to run
    the MXU at bf16-operand speed (f32 accumulation); default None keeps f32.
    """
    B, C, Hsp, Wsp = x.shape
    assert Hsp == Wsp, "module assumes square spatial dims (uses x.shape[-1])"
    S = Hsp * Wsp
    scale = hidden_size ** (-0.5)

    # Query-tile size: 128 lanes when possible (lane-dense stores, 2+ grid
    # steps so both v7x TensorCores get work); otherwise the whole axis.
    TQ = 128 if (S % 128 == 0 and S > 128) else S
    nq = S // TQ

    # Channel-major view: free reshape (no transpose); also the output layout.
    x_cs = x.reshape(B, C, S)

    # Weights in channel-major form; attention scale folded into Q weights/bias.
    wq_t = (params["wq"] * scale).T                                   # (H, C)
    bq_col = (params["bq"] * scale).T                                 # (H, 1)
    wkv_t = jnp.concatenate([params["wk"].T, params["wv"].T], axis=0)  # (2H, C)
    bkv_col = jnp.concatenate([params["bk"].T, params["bv"].T], axis=0)  # (2H, 1)
    wo_t = params["wo"].T                                             # (C, H)
    bo_col = params["bo"].T                                           # (C, 1)

    kernel = functools.partial(_attention_kernel, hidden_size=hidden_size,
                               q_tile=TQ, compute_dtype=compute_dtype)

    # TODO(synk): for S >~ 2048 additionally tile the key axis (online softmax)
    # to stay inside v5e/v7x VMEM budgets.
    out_cs = pl.pallas_call(
        kernel,
        out_shape=jax.ShapeDtypeStruct((B, C, S), x.dtype),
        grid_spec=pltpu.PrefetchScalarGridSpec(
            num_scalar_prefetch=0,
            grid=(nq,),
            in_specs=[
                pl.BlockSpec((B, C, S), lambda qi: (0, 0, 0)),              # x_cs
                pl.BlockSpec((hidden_size, C), lambda qi: (0, 0)),          # wq_t
                pl.BlockSpec((hidden_size, 1), lambda qi: (0, 0)),          # bq_col
                pl.BlockSpec((2 * hidden_size, C), lambda qi: (0, 0)),      # wkv_t
                pl.BlockSpec((2 * hidden_size, 1), lambda qi: (0, 0)),      # bkv_col
                pl.BlockSpec((C, hidden_size), lambda qi: (0, 0)),          # wo_t
                pl.BlockSpec((C, 1), lambda qi: (0, 0)),                    # bo_col
            ],
            out_specs=pl.BlockSpec((B, C, TQ), lambda qi: (0, 0, qi)),
        ),
        compiler_params=pltpu.CompilerParams(
            dimension_semantics=("parallel",)),
    )(x_cs, wq_t, bq_col, wkv_t, bkv_col, wo_t, bo_col)

    # Channel-major output -> NCHW is a free reshape (no transpose).
    return out_cs.reshape(B, C, Hsp, Wsp)


def init_params(key, channel, hidden_size, dtype=jnp.float32):
    ks = jax.random.split(key, 8)
    s_in = 1.0 / jnp.sqrt(channel)
    s_hid = 1.0 / jnp.sqrt(hidden_size)
    return {
        # stored already transposed for x @ W (PyTorch Linear uses x @ W.T)
        "wq": jax.random.uniform(ks[0], (channel, hidden_size), dtype, -s_in, s_in),
        "bq": jax.random.uniform(ks[1], (1, hidden_size), dtype, -s_in, s_in),
        "wk": jax.random.uniform(ks[2], (channel, hidden_size), dtype, -s_in, s_in),
        "bk": jax.random.uniform(ks[3], (1, hidden_size), dtype, -s_in, s_in),
        "wv": jax.random.uniform(ks[4], (channel, hidden_size), dtype, -s_in, s_in),
        "bv": jax.random.uniform(ks[5], (1, hidden_size), dtype, -s_in, s_in),
        "wo": jax.random.uniform(ks[6], (hidden_size, channel), dtype, -s_hid, s_hid),
        "bo": jax.random.uniform(ks[7], (1, channel), dtype, -s_hid, s_hid),
    }


def attention_reference(x, params, hidden_size):
    """Pure-JAX reference mirroring the PyTorch forward exactly (f32 precision)."""
    HI = jax.lax.Precision.HIGHEST
    B, C, Hsp, Wsp = x.shape
    S = Hsp * Wsp
    xt = jnp.transpose(x.reshape(B, C, S), (0, 2, 1))            # (B, S, C)
    q = jnp.dot(xt, params["wq"], precision=HI) + params["bq"]
    k = jnp.dot(xt, params["wk"], precision=HI) + params["bk"]
    v = jnp.dot(xt, params["wv"], precision=HI) + params["bv"]
    att = jnp.einsum("bic,bjc->bij", q, k, precision=HI) * hidden_size ** (-0.5)
    att = jax.nn.softmax(att, axis=-1)
    att_out = jnp.einsum("bij,bjc->bic", att, v, precision=HI)
    ans = jnp.dot(att_out, params["wo"], precision=HI) + params["bo"]
    ans = jnp.transpose(ans, (0, 2, 1)).reshape(B, C, Hsp, Wsp)
    return ans + x


if __name__ == "__main__":
    B, C, SP = 2, 4, 16        # batch, channel, spatial (H = W = 16 -> S = 256)
    HIDDEN = 32

    key = jax.random.PRNGKey(0)
    kx, kp = jax.random.split(key)
    x = jax.random.normal(kx, (B, C, SP, SP), dtype=jnp.float32)
    params = init_params(kp, C, HIDDEN)

    out = attention_forward(x, params, HIDDEN)
    out = jax.block_until_ready(out)

    ref = attention_reference(x, params, HIDDEN)
    assert out.shape == (B, C, SP, SP)
    assert jnp.allclose(out, ref, atol=2e-4, rtol=2e-4), \
        float(jnp.max(jnp.abs(out - ref)))

    print("KERNEL_OK")
</pallas_src>

<mosaic_0001>
module attributes {stable_mosaic.version = 11 : i64} {
  func.func @_attention_kernel(%arg0: i32, %arg1: memref<2x4x256xf32, #tpu.memory_space<vmem>>, %arg2: memref<32x4xf32, #tpu.memory_space<vmem>>, %arg3: memref<32x1xf32, #tpu.memory_space<vmem>>, %arg4: memref<64x4xf32, #tpu.memory_space<vmem>>, %arg5: memref<64x1xf32, #tpu.memory_space<vmem>>, %arg6: memref<4x32xf32, #tpu.memory_space<vmem>>, %arg7: memref<4x1xf32, #tpu.memory_space<vmem>>, %arg8: memref<2x4x128xf32, #tpu.memory_space<vmem>>) attributes {dimension_semantics = [#tpu.dimension_semantics<parallel>], iteration_bounds = array<i64: 2>, scalar_prefetch = 0 : i64, scratch_operands = 0 : i64, tpu.core_type = #tpu.core_type<tc>, window_params = [{pipeline_mode = #tpu.pipeline_mode<synchronous>, transform_indices = @transform_0, window_bounds = array<i64: 2, 4, 256>}, {pipeline_mode = #tpu.pipeline_mode<synchronous>, transform_indices = @transform_1, window_bounds = array<i64: 32, 4>}, {pipeline_mode = #tpu.pipeline_mode<synchronous>, transform_indices = @transform_2, window_bounds = array<i64: 32, 1>}, {pipeline_mode = #tpu.pipeline_mode<synchronous>, transform_indices = @transform_3, window_bounds = array<i64: 64, 4>}, {pipeline_mode = #tpu.pipeline_mode<synchronous>, transform_indices = @transform_4, window_bounds = array<i64: 64, 1>}, {pipeline_mode = #tpu.pipeline_mode<synchronous>, transform_indices = @transform_5, window_bounds = array<i64: 4, 32>}, {pipeline_mode = #tpu.pipeline_mode<synchronous>, transform_indices = @transform_6, window_bounds = array<i64: 4, 1>}, {transform_indices = @transform_7, window_bounds = array<i64: 2, 4, 128>}]} {
    %c128_i32 = arith.constant 128 : i32
    %0 = arith.muli %arg0, %c128_i32 : i32
    %1 = tpu.assume_multiple %0, 128 : i32
    %c0 = arith.constant 0 : index
    %c0_0 = arith.constant 0 : index
    %2 = vector.load %arg2[%c0, %c0_0] : memref<32x4xf32, #tpu.memory_space<vmem>>, vector<32x4xf32>
    %c0_1 = arith.constant 0 : index
    %c0_2 = arith.constant 0 : index
    %3 = vector.load %arg3[%c0_1, %c0_2] : memref<32x1xf32, #tpu.memory_space<vmem>>, vector<32x1xf32>
    %c0_3 = arith.constant 0 : index
    %c0_4 = arith.constant 0 : index
    %4 = vector.load %arg4[%c0_3, %c0_4] : memref<64x4xf32, #tpu.memory_space<vmem>>, vector<64x4xf32>
    %c0_5 = arith.constant 0 : index
    %c0_6 = arith.constant 0 : index
    %5 = vector.load %arg5[%c0_5, %c0_6] : memref<64x1xf32, #tpu.memory_space<vmem>>, vector<64x1xf32>
    %c0_7 = arith.constant 0 : index
    %c0_8 = arith.constant 0 : index
    %6 = vector.load %arg6[%c0_7, %c0_8] : memref<4x32xf32, #tpu.memory_space<vmem>>, vector<4x32xf32>
    %c0_9 = arith.constant 0 : index
    %c0_10 = arith.constant 0 : index
    %7 = vector.load %arg7[%c0_9, %c0_10] : memref<4x1xf32, #tpu.memory_space<vmem>>, vector<4x1xf32>
    %c0_11 = arith.constant 0 : index
    %c0_12 = arith.constant 0 : index
    %c0_13 = arith.constant 0 : index
    %8 = vector.load %arg1[%c0_11, %c0_12, %c0_13] : memref<2x4x256xf32, #tpu.memory_space<vmem>>, vector<1x4x256xf32>
    %9 = vector.shape_cast %8 : vector<1x4x256xf32> to vector<4x256xf32>
    %c0_14 = arith.constant 0 : index
    %c0_15 = arith.constant 0 : index
    %10 = arith.index_cast %1 : i32 to index
    %11 = vector.load %arg1[%c0_14, %c0_15, %10] : memref<2x4x256xf32, #tpu.memory_space<vmem>>, vector<1x4x128xf32>
    %12 = vector.shape_cast %11 : vector<1x4x128xf32> to vector<4x128xf32>
    %cst = arith.constant dense<0.000000e+00> : vector<32x128xf32>
    %13 = tpu.matmul %2, %12, %cst {dimension_numbers = #tpu.dot_dimension_numbers<[1], [0], [0], [1], [0, 0, 1, 1], [], []>} : vector<32x4xf32>, vector<4x128xf32>, vector<32x128xf32> -> vector<32x128xf32>
    %14 = vector.broadcast %3 : vector<32x1xf32> to vector<32x128xf32>
    %15 = arith.addf %13, %14 : vector<32x128xf32>
    %cst_16 = arith.constant dense<0.000000e+00> : vector<64x256xf32>
    %16 = tpu.matmul %4, %9, %cst_16 {dimension_numbers = #tpu.dot_dimension_numbers<[1], [0], [0], [1], [0, 0, 1, 1], [], []>} : vector<64x4xf32>, vector<4x256xf32>, vector<64x256xf32> -> vector<64x256xf32>
    %17 = vector.broadcast %5 : vector<64x1xf32> to vector<64x256xf32>
    %18 = arith.addf %16, %17 : vector<64x256xf32>
    %19 = vector.extract_strided_slice %18 {offsets = [0, 0], sizes = [32, 256], strides = [1, 1]} : vector<64x256xf32> to vector<32x256xf32>
    %20 = vector.extract_strided_slice %18 {offsets = [32, 0], sizes = [32, 256], strides = [1, 1]} : vector<64x256xf32> to vector<32x256xf32>
    %cst_17 = arith.constant dense<0.000000e+00> : vector<128x256xf32>
    %21 = tpu.matmul %15, %19, %cst_17 {dimension_numbers = #tpu.dot_dimension_numbers<[0], [0], [1], [1], [0, 1, 1, 1], [], []>} : vector<32x128xf32>, vector<32x256xf32>, vector<128x256xf32> -> vector<128x256xf32>
    %cst_18 = arith.constant dense<0xFF800000> : vector<128xf32>
    %22 = vector.multi_reduction <maximumf>, %21, %cst_18 [1] : vector<128x256xf32> to vector<128xf32>
    %23 = vector.shape_cast %22 : vector<128xf32> to vector<128x1xf32>
    %24 = vector.broadcast %23 : vector<128x1xf32> to vector<128x256xf32>
    %25 = arith.subf %21, %24 : vector<128x256xf32>
    %26 = math.exp %25 : vector<128x256xf32>
    %cst_19 = arith.constant dense<0.000000e+00> : vector<128xf32>
    %27 = vector.multi_reduction <add>, %26, %cst_19 [1] : vector<128x256xf32> to vector<128xf32>
    %28 = vector.shape_cast %27 : vector<128xf32> to vector<128x1xf32>
    %cst_20 = arith.constant dense<0.000000e+00> : vector<128x32xf32>
    %29 = tpu.matmul %26, %20, %cst_20 {dimension_numbers = #tpu.dot_dimension_numbers<[1], [1], [0], [0], [0, 0, 1, 0], [], []>} : vector<128x256xf32>, vector<32x256xf32>, vector<128x32xf32> -> vector<128x32xf32>
    %30 = tpu.reciprocal %28 {approx = true} : vector<128x1xf32> -> vector<128x1xf32>
    %31 = arith.mulf %28, %30 : vector<128x1xf32>
    %cst_21 = arith.constant 2.000000e+00 : f32
    %32 = vector.broadcast %cst_21 : f32 to vector<128x1xf32>
    %33 = arith.subf %32, %31 : vector<128x1xf32>
    %34 = arith.mulf %30, %33 : vector<128x1xf32>
    %35 = vector.broadcast %34 : vector<128x1xf32> to vector<128x32xf32>
    %36 = arith.mulf %29, %35 : vector<128x32xf32>
    %cst_22 = arith.constant dense<0.000000e+00> : vector<4x128xf32>
    %37 = tpu.matmul %6, %36, %cst_22 {dimension_numbers = #tpu.dot_dimension_numbers<[1], [1], [0], [0], [0, 0, 1, 0], [], []>} : vector<4x32xf32>, vector<128x32xf32>, vector<4x128xf32> -> vector<4x128xf32>
    %38 = vector.broadcast %7 : vector<4x1xf32> to vector<4x128xf32>
    %39 = arith.addf %37, %38 : vector<4x128xf32>
    %40 = arith.addf %39, %12 : vector<4x128xf32>
    %c0_23 = arith.constant 0 : index
    %c0_24 = arith.constant 0 : index
    %c0_25 = arith.constant 0 : index
    %41 = vector.load %arg8[%c0_23, %c0_24, %c0_25] : memref<2x4x128xf32, #tpu.memory_space<vmem>>, vector<1x4x128xf32>
    %42 = vector.shape_cast %41 : vector<1x4x128xf32> to vector<4x128xf32>
    %43 = vector.shape_cast %40 : vector<4x128xf32> to vector<1x4x128xf32>
    tpu.vector_store %arg8[%c0_23, %c0_24, %c0_25], %43 {strides = array<i32>} : memref<2x4x128xf32, #tpu.memory_space<vmem>>, vector<1x4x128xf32>,
    %c1 = arith.constant 1 : index
    %c0_26 = arith.constant 0 : index
    %c0_27 = arith.constant 0 : index
    %44 = vector.load %arg1[%c1, %c0_26, %c0_27] : memref<2x4x256xf32, #tpu.memory_space<vmem>>, vector<1x4x256xf32>
    %45 = vector.shape_cast %44 : vector<1x4x256xf32> to vector<4x256xf32>
    %c1_28 = arith.constant 1 : index
    %c0_29 = arith.constant 0 : index
    %46 = arith.index_cast %1 : i32 to index
    %47 = vector.load %arg1[%c1_28, %c0_29, %46] : memref<2x4x256xf32, #tpu.memory_space<vmem>>, vector<1x4x128xf32>
    %48 = vector.shape_cast %47 : vector<1x4x128xf32> to vector<4x128xf32>
    %cst_30 = arith.constant dense<0.000000e+00> : vector<32x128xf32>
    %49 = tpu.matmul %2, %48, %cst_30 {dimension_numbers = #tpu.dot_dimension_numbers<[1], [0], [0], [1], [0, 0, 1, 1], [], []>} : vector<32x4xf32>, vector<4x128xf32>, vector<32x128xf32> -> vector<32x128xf32>
    %50 = vector.broadcast %3 : vector<32x1xf32> to vector<32x128xf32>
    %51 = arith.addf %49, %50 : vector<32x128xf32>
    %cst_31 = arith.constant dense<0.000000e+00> : vector<64x256xf32>
    %52 = tpu.matmul %4, %45, %cst_31 {dimension_numbers = #tpu.dot_dimension_numbers<[1], [0], [0], [1], [0, 0, 1, 1], [], []>} : vector<64x4xf32>, vector<4x256xf32>, vector<64x256xf32> -> vector<64x256xf32>
    %53 = vector.broadcast %5 : vector<64x1xf32> to vector<64x256xf32>
    %54 = arith.addf %52, %53 : vector<64x256xf32>
    %55 = vector.extract_strided_slice %54 {offsets = [0, 0], sizes = [32, 256], strides = [1, 1]} : vector<64x256xf32> to vector<32x256xf32>
    %56 = vector.extract_strided_slice %54 {offsets = [32, 0], sizes = [32, 256], strides = [1, 1]} : vector<64x256xf32> to vector<32x256xf32>
    %cst_32 = arith.constant dense<0.000000e+00> : vector<128x256xf32>
    %57 = tpu.matmul %51, %55, %cst_32 {dimension_numbers = #tpu.dot_dimension_numbers<[0], [0], [1], [1], [0, 1, 1, 1], [], []>} : vector<32x128xf32>, vector<32x256xf32>, vector<128x256xf32> -> vector<128x256xf32>
    %cst_33 = arith.constant dense<0xFF800000> : vector<128xf32>
    %58 = vector.multi_reduction <maximumf>, %57, %cst_33 [1] : vector<128x256xf32> to vector<128xf32>
    %59 = vector.shape_cast %58 : vector<128xf32> to vector<128x1xf32>
    %60 = vector.broadcast %59 : vector<128x1xf32> to vector<128x256xf32>
    %61 = arith.subf %57, %60 : vector<128x256xf32>
    %62 = math.exp %61 : vector<128x256xf32>
    %cst_34 = arith.constant dense<0.000000e+00> : vector<128xf32>
    %63 = vector.multi_reduction <add>, %62, %cst_34 [1] : vector<128x256xf32> to vector<128xf32>
    %64 = vector.shape_cast %63 : vector<128xf32> to vector<128x1xf32>
    %cst_35 = arith.constant dense<0.000000e+00> : vector<128x32xf32>
    %65 = tpu.matmul %62, %56, %cst_35 {dimension_numbers = #tpu.dot_dimension_numbers<[1], [1], [0], [0], [0, 0, 1, 0], [], []>} : vector<128x256xf32>, vector<32x256xf32>, vector<128x32xf32> -> vector<128x32xf32>
    %66 = tpu.reciprocal %64 {approx = true} : vector<128x1xf32> -> vector<128x1xf32>
    %67 = arith.mulf %64, %66 : vector<128x1xf32>
    %cst_36 = arith.constant 2.000000e+00 : f32
    %68 = vector.broadcast %cst_36 : f32 to vector<128x1xf32>
    %69 = arith.subf %68, %67 : vector<128x1xf32>
    %70 = arith.mulf %66, %69 : vector<128x1xf32>
    %71 = vector.broadcast %70 : vector<128x1xf32> to vector<128x32xf32>
    %72 = arith.mulf %65, %71 : vector<128x32xf32>
    %cst_37 = arith.constant dense<0.000000e+00> : vector<4x128xf32>
    %73 = tpu.matmul %6, %72, %cst_37 {dimension_numbers = #tpu.dot_dimension_numbers<[1], [1], [0], [0], [0, 0, 1, 0], [], []>} : vector<4x32xf32>, vector<128x32xf32>, vector<4x128xf32> -> vector<4x128xf32>
    %74 = vector.broadcast %7 : vector<4x1xf32> to vector<4x128xf32>
    %75 = arith.addf %73, %74 : vector<4x128xf32>
    %76 = arith.addf %75, %48 : vector<4x128xf32>
    %c1_38 = arith.constant 1 : index
    %c0_39 = arith.constant 0 : index
    %c0_40 = arith.constant 0 : index
    %77 = vector.load %arg8[%c1_38, %c0_39, %c0_40] : memref<2x4x128xf32, #tpu.memory_space<vmem>>, vector<1x4x128xf32>
    %78 = vector.shape_cast %77 : vector<1x4x128xf32> to vector<4x128xf32>
    %79 = vector.shape_cast %76 : vector<4x128xf32> to vector<1x4x128xf32>
    tpu.vector_store %arg8[%c1_38, %c0_39, %c0_40], %79 {strides = array<i32>} : memref<2x4x128xf32, #tpu.memory_space<vmem>>, vector<1x4x128xf32>,
    return
  }
  func.func @transform_0(%arg0: i32) -> (i32, i32, i32) {
    %c0_i32 = arith.constant 0 : i32
    %c0_i32_0 = arith.constant 0 : i32
    %c0_i32_1 = arith.constant 0 : i32
    %c0_i32_2 = arith.constant 0 : i32
    return %c0_i32, %c0_i32_0, %c0_i32_1 : i32, i32, i32
  }
  func.func @transform_1(%arg0: i32) -> (i32, i32) {
    %c0_i32 = arith.constant 0 : i32
    %c0_i32_0 = arith.constant 0 : i32
    %c0_i32_1 = arith.constant 0 : i32
    return %c0_i32, %c0_i32_0 : i32, i32
  }
  func.func @transform_2(%arg0: i32) -> (i32, i32) {
    %c0_i32 = arith.constant 0 : i32
    %c0_i32_0 = arith.constant 0 : i32
    %c0_i32_1 = arith.constant 0 : i32
    return %c0_i32, %c0_i32_0 : i32, i32
  }
  func.func @transform_3(%arg0: i32) -> (i32, i32) {
    %c0_i32 = arith.constant 0 : i32
    %c0_i32_0 = arith.constant 0 : i32
    %c0_i32_1 = arith.constant 0 : i32
    return %c0_i32, %c0_i32_0 : i32, i32
  }
  func.func @transform_4(%arg0: i32) -> (i32, i32) {
    %c0_i32 = arith.constant 0 : i32
    %c0_i32_0 = arith.constant 0 : i32
    %c0_i32_1 = arith.constant 0 : i32
    return %c0_i32, %c0_i32_0 : i32, i32
  }
  func.func @transform_5(%arg0: i32) -> (i32, i32) {
    %c0_i32 = arith.constant 0 : i32
    %c0_i32_0 = arith.constant 0 : i32
    %c0_i32_1 = arith.constant 0 : i32
    return %c0_i32, %c0_i32_0 : i32, i32
  }
  func.func @transform_6(%arg0: i32) -> (i32, i32) {
    %c0_i32 = arith.constant 0 : i32
    %c0_i32_0 = arith.constant 0 : i32
    %c0_i32_1 = arith.constant 0 : i32
    return %c0_i32, %c0_i32_0 : i32, i32
  }
  func.func @transform_7(%arg0: i32) -> (i32, i32, i32) {
    %c0_i32 = arith.constant 0 : i32
    %c0_i32_0 = arith.constant 0 : i32
    %c0_i32_1 = arith.constant 0 : i32
    return %c0_i32, %c0_i32_0, %arg0 : i32, i32, i32
  }
}

</mosaic_0001>

<bundles_post_ra>
// kernel: tpu_custom_call.1
= control target key start
LH: loop header
LB: loop body
LE: loop exit
PB: predicated region body
PF: predicated region fallthrough
CT: control target
= control target key end

     0   :  { %12 = vsyncpa [#allocation3], 0  ;;  %s3988_s0 = inlined_call_operand.vmem [shape: f32[2,4,256], index: 0, kind: input, shape index: {}]   ;;  %s3989_s1 = inlined_call_operand.vmem [shape: f32[32,4], index: 1, kind: input, shape index: {}]   ;;  %s3990_s2 = inlined_call_operand.vmem [shape: f32[32,1], index: 2, kind: input, shape index: {}]   ;;  %s3991_s3 = inlined_call_operand.vmem [shape: f32[64,4], index: 3, kind: input, shape index: {}]   ;;  %s3992_s4 = inlined_call_operand.vmem [shape: f32[64,1], index: 4, kind: input, shape index: {}]   ;;  %s3993_s5 = inlined_call_operand.vmem [shape: f32[4,32], index: 5, kind: input, shape index: {}]   ;;  %s3994_s6 = inlined_call_operand.vmem [shape: f32[4,1], index: 6, kind: input, shape index: {}]   ;;  %s3995_s7 = inlined_call_operand.hbm [shape: f32[2,4,256], index: 7, kind: output, shape index: {}]  }
   0x1   :  { %14 = vsyncpa [#allocation3 + $0x1], 0  ;;  %s3043_s24 = smov 0   ;;  %s3045_s25 = smov 0  }
   0x2   :  { %s3047_s26 = smov 0   ;;  %s3049_s27 = smov 0  }
   0x3 LB: > { %s3064_s28 = sadd.s32 4294967295, %s2994_s27   ;;  %s2442_s29 = sadd.s32 4294967294, %s2994_s27   ;;  %s2994_s27 = sphi %s3049_s27, %s4001_s27   ;;  %s2990_s26 = sphi %s3047_s26, %s4000_s26   ;;  %s2986_s25 = sphi %s3045_s25, %s3999_s25   ;;  %s2982_s24 = sphi %s3043_s24, %s3998_s24  }
   0x4   : > { %s3068_s30 = sadd.s32 1, %s2994_s27   ;;  %s174_s8 = sadd.s32 1, %s2990_s26 }
   0x5   : > { %s171_s9 = ssub.s32 %s2994_s27, %s3068_s30  ;;  %p184_p0 = scmp.ne.s32.totalorder %s2990_s26, %s2986_s25 }
   0x6   : > { %p172_p1 = scmp.eq.s32.totalorder %s171_s9, 0  ;;  %p185_p2 = scmp.eq.s32.totalorder %s3064_s28, 1 }
   0x7   : > { %p190_p3 = scmp.ne.s32.totalorder %s2986_s25, %s2982_s24  ;;  %p191_p4 = scmp.eq.s32.totalorder %s2442_s29, 1 }
   0x8   : > { %s3079_s10 = scalar_select %p172_p1, %s2990_s26, %s174_s8  }
   0x9   : > { %p3081_p5 = por %p185_p2, %p184_p0  ;;  %p3085_p6 = por %p191_p4, %p190_p3 }
   0xa   : > { %p2444_p7 = scmp.ge.s32.totalorder %s2994_s27, 1  ;;  %p230_p8 = scmp.lt.s32.totalorder %s2994_s27, 3 }
   0xc   : > { %p231_p9 = pnand %p2444_p7, %p230_p8 }
   0xd   : > { %s2446_s15 = sshll.u32 (!%p231_p9), %s3064_s28, 7  ;;  %s254_s9 = sand.u32 (!%p231_p9), 1, %s2986_s25  }
   0xe   : > { %234 = sbr.rel (%p231_p9) target bundleno = 2171 (0x87b), region = 48  ;;  %s285_s16 = sshra.s32 (!%p231_p9), %s2446_s15, 7 }
   0xf   : > { %s2447_s19 = sshll.u32 (!%p231_p9), %s285_s16, 2  ;;  %s2445_s13 = sshll.u32 (!%p231_p9), %s254_s9, 3 }
  0x10   : > { %s3110_s29 = scalar_lea.vmem (!%p231_p9), %s3988_s0, %s2447_s19  ;;  %s3876_s14 = scalar_lea.vmem (!%p231_p9), [#allocation2], %s2445_s13 }
  0x11   : > { %s2387_s17 = sshll.u32 (!%p231_p9), %s3876_s14, 4  ;;  %s2549_s18 = sshll.u32 (!%p231_p9), %s3064_s28, 6  ;;  %s3936_s17 = int_to_ptr.vmem [resolvable:$true] %s2387_s17 }
  0x12   : > { %s3942_s21 = scalar_lea.hbm (!%p231_p9), %s3995_s7, %s2549_s18  ;;  %s3948_s22 = scalar_lea.sflag (!%p231_p9), [#allocation3], %s254_s9 }
  0x13   : > { %v284_v0 = vld [vmem:[%s3988_s0] sm:$0xff]  ;;  %vm323_vm0 = vcmask 1043456   ;;  %vm310_vm1 = vcmask 31744   ;;  %v2996_v2 = vmov 0.0   ;;  %v2997_v5 = vmov 0   ;;  %v3117_v7 = vld [vmem:[%s3989_s1 + $0x8] sm:$0xff] }
  0x14   : > { %v453_v1 = vcombine.high %v284_v0, %v284_v0  ;;  %546 = vmatprep.mubr.f32.mxu1 %v2996_v2  ;;  %v3099_v3 = vld [vmem:[%s3989_s1] sm:$0xff]  ;;  %2728 = vset.pattern.permute.xlu1 %v2997_v5  ;;  %v3124_v8 = vld [vmem:[%s3989_s1 + $0x10] sm:$0xff]  ;;  %v267_v11 = vld [vmem:[%s3991_s3 + $0x8] sm:$0xff]  ;;  %vm627_vm2 = vcmask 261120   ;;  %vm2998_vm3 = vmmov 0   ;;  %s2934_s28 = scalar_lea.vmem %s3936_s17, 128 }
  0x15   : > { %v266_v4 = vld [vmem:[%s3991_s3] sm:$0xff]  ;;  %2598 = vmatprep.mubr.msk.f32.mxu0 %vm310_vm1, %v3099_v3  ;;  %2727 = vset.pattern.permute.xlu0 %v2997_v5  ;;  %v264_v9 = vld [vmem:[%s3990_s2 + $0x10] sm:$0xff]  ;;  %v3144_v12 = vld [vmem:[%s3989_s1 + $0x18] sm:$0xff]  ;;  %p2935_p10 = scmp.ne.s32.totalorder %s3936_s17, %s2934_s28  ;;  %s2999_s23 = smov [#allocation2]  }
  0x16   : > { %2453 = vmatprep.subr.msk.mxu1 %vm323_vm0, %v453_v1  ;;  %v289_v6 = vld [vmem:[%s3110_s29] sm:$0xf]  ;;  %302 = vperm.xlu1 %2728, %v264_v9   ;;  %v265_v13 = vld [vmem:[%s3990_s2 + $0x18] sm:$0xff]  ;;  %v263_v14 = vld [vmem:[%s3990_s2 + $0x8] sm:$0xff]  ;;  %s2938_s8 = sshll.u32 %s2999_s23, 4  ;;  %s2939_s8 = int_to_ptr.vmem [resolvable:$false] %s2938_s8 }
  0x17   : > { %2454 = vmatpush1.msk.msra.mxu1 %vm323_vm0, %v284_v0  ;;  %2596 = vmatprep.subr.msk.mxu0 %vm323_vm0, %v289_v6  ;;  %v262_v10 = vld [vmem:[%s3990_s2] sm:$0xff]  ;;  %v268_v15 = vld [vmem:[%s3991_s3 + $0x10] sm:$0xff]  ;;  %v277_v17 = vld [vmem:[%s3992_s4 + $0x18] sm:$0xff]  ;;  %p2936_p11 = pnand %p2935_p10, %p3081_p5  ;;  %s2940_s13 = scalar_lea.vmem %s2939_s8, 256 }
  0x18   : > { %2455 = vmatmul.mubr.msk.f32.vlgmr.msra.gmra.mxu1 %vm310_vm1, %v266_v4  ;;  %2597 = vmatpush3.msk.msra.mxu0 %vm323_vm0, %v289_v6  ;;  %v276_v16 = vld [vmem:[%s3992_s4 + $0x10] sm:$0xff]  ;;  %v269_v18 = vld [vmem:[%s3991_s3 + $0x18] sm:$0xff]  ;;  %v274_v19 = vld [vmem:[%s3992_s4] sm:$0xff]  ;;  %p2941_p13 = scmp.lt.s32.totalorder %s3936_s17, %s2939_s8  ;;  %p2942_p0 = scmp.lt.s32.totalorder %s2940_s13, %s2934_s28 }
  0x19   : > { %552 = vmatprep.mubr.f32.mxu1 %v2996_v2  ;;  %2599 = vmatmul.mubr.msk.f32.vlgmr.msra.gmra.mxu0 %vm310_vm1, %v3117_v7  ;;  %v275_v20 = vld [vmem:[%s3992_s4 + $0x8] sm:$0xff]  ;;  %v270_v21 = vld [vmem:[%s3991_s3 + $0x20] sm:$0xff]  ;;  %v281_v22 = vld [vmem:[%s3992_s4 + $0x38] sm:$0xff]  ;;  %p2937_p12 = pneg %p2936_p11 }
  0x1a   : > { %2601 = vmatprep.mubr.msk.f32.mxu0 %vm310_vm1, %v3124_v8  ;;  %292 = vperm.xlu0 %2727, %v262_v10   ;;  %v271_v23 = vld [vmem:[%s3991_s3 + $0x28] sm:$0xff]  ;;  %v280_v24 = vld [vmem:[%s3992_s4 + $0x30] sm:$0xff]  ;;  %v273_v26 = vld [vmem:[%s3991_s3 + $0x38] sm:$0xff]  ;;  %p2943_p1 = por %p2942_p0, %p2941_p13 }
  0x1b   : > { %307 = vperm.xlu1 %2728, %v265_v13   ;;  %v272_v25 = vld [vmem:[%s3991_s3 + $0x30] sm:$0xff] }
  0x1c   : > { %2456 = vmatmul.mubr.msk.f32.gmra.mxu1 %vm310_vm1, %v267_v11  ;;  %p2944_p2 = pnand %p2943_p1, %p2937_p12 }
  0x1d   : > { %558 = vmatprep.mubr.f32.mxu1 %v2996_v2  ;;  %2602 = vmatmul.mubr.msk.f32.gmra.mxu0 %vm310_vm1, %v3144_v12 }
  0x1e   : > { %297 = vperm.xlu0 %2727, %v263_v14   ;;  %740 = vmatprep.mubr.f32.mxu0 %v2996_v2 }
  0x1f   : > { %424 = vperm.xlu1 %2728, %v276_v16  }
  0x20   : > { %2457 = vmatmul.mubr.msk.f32.gmra.mxu1 %vm310_vm1, %v268_v15 }
  0x21   : > { %564 = vmatprep.mubr.f32.mxu1 %v2996_v2 }
  0x22   : > { %429 = vperm.xlu0 %2727, %v277_v17  }
  0x23   : > { %414 = vperm.xlu1 %2728, %v274_v19  }
  0x24   : > { %2458 = vmatmul.mubr.msk.f32.gmra.mxu1 %vm310_vm1, %v269_v18 }
  0x25   : > { %570 = vmatprep.mubr.f32.mxu1 %v2996_v2 }
  0x26   : > { %419 = vperm.xlu0 %2727, %v275_v20  }
  0x27   : > { %449 = vperm.xlu1 %2728, %v281_v22  }
  0x28   : > { %2459 = vmatmul.mubr.msk.f32.gmra.mxu1 %vm310_vm1, %v270_v21 }
  0x29   : > { %576 = vmatprep.mubr.f32.mxu1 %v2996_v2 }
  0x2b   : > { %444 = vperm.xlu1 %2728, %v280_v24  }
  0x2c   : > { %2460 = vmatmul.mubr.msk.f32.gmra.mxu1 %vm310_vm1, %v271_v23 }
  0x2d   : > { %582 = vmatprep.mubr.f32.mxu1 %v2996_v2 }
  0x30   : > { %2461 = vmatmul.mubr.msk.f32.gmra.mxu1 %vm310_vm1, %v272_v25 }
  0x31   : > { %588 = vmatprep.mubr.f32.mxu1 %v2996_v2 }
  0x34   : > { %2462 = vmatmul.mubr.msk.f32.gmra.mxu1 %vm310_vm1, %v273_v26 }
  0x91   : > { %v3206_v29 = vpop.permute.xlu1 %302 }
  0x95   : > { %v3204_v27 = vpop.permute.xlu0 %292 }
  0x96   : > { %v3211_v38 = vpop.permute.xlu1 %307 }
  0x99   : > { %v3208_v34 = vpop.permute.xlu0 %297 }
  0x9a   : > { %v3217_v46 = vpop.permute.xlu1 %424 }
  0x9d   : > { %v3214_v43 = vpop.permute.xlu0 %429 }
  0x9e   : > { %v3231_v57 = vpop.permute.xlu1 %414 }
  0xa1   : > { %v3223_v51 = vpop.permute.xlu0 %419 }
  0xa2   : > { %v3241_v0 = vpop.permute.xlu1 %449 }
  0xa6   : > { %v3244_v9 = vpop.permute.xlu1 %444 }
  0xd8   : > { %v548_v28 = vpop.f32.mrf.mxu1 }
  0xd9   : > { %v2600_v30 = vpop.f32.mrf.mxu0  ;;  %v549_v62 = vadd.f32 %v548_v28, %v3231_v57 }
  0xda   : > { %v550_v31 = vpop.f32.mrf.mxu1  ;;  %v399_v40 = vadd.f32 %v2600_v30, %v3208_v34 }
  0xdb   : > { %v393_v33 = vpop.f32.mrf.mxu0  ;;  %v551_v60 = vadd.f32 %v550_v31, %v3231_v57 }
  0xdc   : > { %v554_v32 = vpop.f32.mrf.mxu1  ;;  %v394_v35 = vadd.f32 %v393_v33, %v3204_v27 }
  0xdd   : > { %v2603_v37 = vpop.f32.mrf.mxu0  ;;  %v555_v58 = vadd.f32 %v554_v32, %v3223_v51 }
  0xde   : > { %v556_v36 = vpop.f32.mrf.mxu1  ;;  %595 = vxpose.xlu0.b32.start [1/4] (short) %v394_v35, 128  ;;  %v409_v52 = vadd.f32 %v2603_v37, %v3211_v38 }
  0xdf   : > { %v403_v41 = vpop.f32.mrf.mxu0  ;;  %v557_v56 = vadd.f32 %v556_v36, %v3223_v51 }
  0xe0   : > { %v560_v39 = vpop.f32.mrf.mxu1  ;;  %v404_v45 = vadd.f32 %v403_v41, %v3206_v29 }
  0xe1   : > { %v561_v54 = vadd.f32 %v560_v39, %v3217_v46 }
  0xe2   : > { %v562_v42 = vpop.f32.mrf.mxu1  ;;  %596 = vxpose.xlu0.b32.cont [2/4] (short) %v399_v40, 128 }
  0xe3   : > { %v563_v53 = vadd.f32 %v562_v42, %v3217_v46 }
  0xe4   : > { %v566_v44 = vpop.f32.mrf.mxu1 }
  0xe5   : > { %v567_v49 = vadd.f32 %v566_v44, %v3214_v43 }
  0xe6   : > { %v568_v47 = vpop.f32.mrf.mxu1  ;;  %597 = vxpose.xlu0.b32.cont [3/4] (short) %v404_v45, 128 }
  0xe7   : > { %v569_v48 = vadd.f32 %v568_v47, %v3214_v43 }
  0xe8   : > { %v3221_v50 = vpop.f32.mrf.mxu1 }
  0xe9   : > { %700 = vmatprep.subr.mxu0 %v569_v48 }
  0xea   : > { %v3228_v55 = vpop.f32.mrf.mxu1  ;;  %701 = vmatpush1.msra.mxu0 %v567_v49  ;;  %598 = vxpose.xlu0.b32.end [4/4] (short) %v409_v52, 128 }
  0xeb   : > { %702 = vmatprep.subr.mxu0 %v563_v53  ;;  %v279_v53 = vld [vmem:[%s3992_s4 + $0x28] sm:$0xff] }
  0xec   : > { %v3234_v59 = vpop.f32.mrf.mxu1  ;;  %703 = vmatpush1.msra.mxu0 %v561_v54 }
  0xed   : > { %704 = vmatprep.subr.mxu0 %v557_v56 }
  0xee   : > { %v3237_v61 = vpop.f32.mrf.mxu1  ;;  %705 = vmatpush1.msra.mxu0 %v555_v58  ;;  %v278_v58 = vld [vmem:[%s3992_s4 + $0x20] sm:$0xff] }
  0xef   : > { %706 = vmatprep.subr.mxu0 %v551_v60 }
  0xf0   : > { %v584_v63 = vpop.f32.mrf.mxu1  ;;  %707 = vmatpush1.msra.mxu0 %v549_v62 }
  0xf1   : > { %2604 = vmatprep.subr.mxu0 %v2996_v2  ;;  %v585_v13 = vadd.f32 %v584_v63, %v3244_v9 }
  0xf2   : > { %v586_v1 = vpop.f32.mrf.mxu1 }
  0xf3   : > { %v587_v11 = vadd.f32 %v586_v1, %v3244_v9 }
  0xf4   : > { %v590_v4 = vpop.f32.mrf.mxu1 }
  0xf5   : > { %v591_v10 = vadd.f32 %v590_v4, %v3241_v0 }
  0xf6   : > { %v592_v5 = vpop.f32.mrf.mxu1 }
  0xf7   : > { %v593_v6 = vadd.f32 %v592_v5, %v3241_v0 }
  0xf9   : > { %1053 = vmatprep.subr.mxu1 %v593_v6 }
  0xfa   : > { %1054 = vmatpush1.xpose.msra.mxu1 %v591_v10 }
  0xfb   : > { %1055 = vmatprep.subr.mxu1 %v587_v11 }
  0xfe   : > { %1056 = vmatpush1.xpose.msra.mxu1 %v585_v13 }
 0x15a   : > { %v611_v14 = vpop.trf.xlu0 }
 0x15b   : > { %2463 = vmatmul.mubr.msk.f32.vlgmr.msra.gmra.mxu0 %vm627_vm2, %v611_v14 }
 0x15c   : > { %746 = vmatprep.mubr.f32.mxu0 %v2996_v2 }
 0x15e   : > { %v612_v15 = vpop.trf.xlu0 }
 0x15f   : > { %2464 = vmatmul.mubr.msk.f32.gmra.mxu0 %vm627_vm2, %v612_v15 }
 0x160   : > { %752 = vmatprep.mubr.f32.mxu0 %v2996_v2 }
 0x162   : > { %v613_v16 = vpop.trf.xlu0 }
 0x163   : > { %2465 = vmatmul.mubr.msk.f32.gmra.mxu0 %vm627_vm2, %v613_v16 }
 0x164   : > { %758 = vmatprep.mubr.f32.mxu0 %v2996_v2 }
 0x166   : > { %v614_v17 = vpop.trf.xlu0 }
 0x167   : > { %2466 = vmatmul.mubr.msk.f32.gmra.mxu0 %vm627_vm2, %v614_v17 }
 0x168   : > { %764 = vmatprep.mubr.f32.mxu0 %v2996_v2 }
 0x16a   : > { %v615_v18 = vpop.trf.xlu0 }
 0x16b   : > { %2467 = vmatmul.mubr.msk.f32.gmra.mxu0 %vm627_vm2, %v615_v18 }
 0x16c   : > { %770 = vmatprep.mubr.f32.mxu0 %v2996_v2 }
 0x16e   : > { %v616_v19 = vpop.trf.xlu0 }
 0x16f   : > { %2468 = vmatmul.mubr.msk.f32.gmra.mxu0 %vm627_vm2, %v616_v19 }
 0x170   : > { %776 = vmatprep.mubr.f32.mxu0 %v2996_v2 }
 0x172   : > { %v617_v20 = vpop.trf.xlu0 }
 0x173   : > { %2469 = vmatmul.mubr.msk.f32.gmra.mxu0 %vm627_vm2, %v617_v20 }
 0x174   : > { %782 = vmatprep.mubr.f32.mxu0 %v2996_v2 }
 0x176   : > { %v618_v21 = vpop.trf.xlu0 }
 0x177   : > { %2470 = vmatmul.mubr.msk.f32.gmra.mxu0 %vm627_vm2, %v618_v21 }
 0x178   : > { %788 = vmatprep.mubr.f32.mxu0 %v2996_v2 }
 0x17a   : > { %v619_v22 = vpop.trf.xlu0 }
 0x17b   : > { %2471 = vmatmul.mubr.msk.f32.gmra.mxu0 %vm627_vm2, %v619_v22 }
 0x17c   : > { %794 = vmatprep.mubr.f32.mxu0 %v2996_v2 }
 0x17e   : > { %v620_v23 = vpop.trf.xlu0 }
 0x17f   : > { %2472 = vmatmul.mubr.msk.f32.gmra.mxu0 %vm627_vm2, %v620_v23 }
 0x180   : > { %800 = vmatprep.mubr.f32.mxu0 %v2996_v2 }
 0x182   : > { %v621_v24 = vpop.trf.xlu0 }
 0x183   : > { %2473 = vmatmul.mubr.msk.f32.gmra.mxu0 %vm627_vm2, %v621_v24 }
 0x184   : > { %806 = vmatprep.mubr.f32.mxu0 %v2996_v2 }
 0x186   : > { %v622_v25 = vpop.trf.xlu0 }
 0x187   : > { %2474 = vmatmul.mubr.msk.f32.gmra.mxu0 %vm627_vm2, %v622_v25 }
 0x188   : > { %812 = vmatprep.mubr.f32.mxu0 %v2996_v2 }
 0x18a   : > { %v623_v26 = vpop.trf.xlu0 }
 0x18b   : > { %2475 = vmatmul.mubr.msk.f32.gmra.mxu0 %vm627_vm2, %v623_v26 }
 0x18c   : > { %818 = vmatprep.mubr.f32.mxu0 %v2996_v2 }
 0x18e   : > { %v624_v28 = vpop.trf.xlu0 }
 0x18f   : > { %2476 = vmatmul.mubr.msk.f32.gmra.mxu0 %vm627_vm2, %v624_v28 }
 0x190   : > { %824 = vmatprep.mubr.f32.mxu0 %v2996_v2 }
 0x192   : > { %v625_v30 = vpop.trf.xlu0 }
 0x193   : > { %2477 = vmatmul.mubr.msk.f32.gmra.mxu0 %vm627_vm2, %v625_v30 }
 0x194   : > { %830 = vmatprep.mubr.f32.mxu0 %v2996_v2 }
 0x196   : > { %v626_v31 = vpop.trf.xlu0 }
 0x197   : > { %2478 = vmatmul.mubr.msk.f32.gmra.mxu0 %vm627_vm2, %v626_v31 }
 0x198   : > { %2636 = vmatprep.mubr.msk.f32.mxu0 %vm2998_vm3, %v2996_v2 }
 0x21b   : > { %v3280_v32 = vpop.f32.mrf.mxu0 }
 0x21d   : > { %v3282_v33 = vpop.f32.mrf.mxu0 }
 0x21e   : > { %v837_v35 = vmax.f32 %v3280_v32, %v3282_v33 }
 0x21f   : > { %v3286_v36 = vpop.f32.mrf.mxu0 }
 0x220   : > { %838 = vmax.xlane.f32.xlu1 %v837_v35 }
 0x221   : > { %v3288_v37 = vpop.f32.mrf.mxu0 }
 0x222   : > { %v840_v39 = vmax.f32 %v3286_v36, %v3288_v37 }
 0x223   : > { %v3292_v40 = vpop.f32.mrf.mxu0 }
 0x224   : > { %841 = vmax.xlane.f32.xlu1 %v840_v39 }
 0x225   : > { %v3294_v41 = vpop.f32.mrf.mxu0 }
 0x226   : > { %v843_v42 = vmax.f32 %v3292_v40, %v3294_v41 }
 0x227   : > { %v3298_v44 = vpop.f32.mrf.mxu0 }
 0x228   : > { %844 = vmax.xlane.f32.xlu0 %v843_v42 }
 0x229   : > { %v3300_v45 = vpop.f32.mrf.mxu0 }
 0x22a   : > { %v846_v11 = vmax.f32 %v3298_v44, %v3300_v45 }
 0x22b   : > { %v3302_v47 = vpop.f32.mrf.mxu0 }
 0x22d   : > { %v3304_v48 = vpop.f32.mrf.mxu0 }
 0x22e   : > { %v849_v15 = vmax.f32 %v3302_v47, %v3304_v48 }
 0x22f   : > { %v3306_v49 = vpop.f32.mrf.mxu0 }
 0x231   : > { %v3308_v52 = vpop.f32.mrf.mxu0 }
 0x232   : > { %v852_v17 = vmax.f32 %v3306_v49, %v3308_v52 }
 0x233   : > { %v3313_v54 = vpop.f32.mrf.mxu0 }
 0x235   : > { %439 = vperm.xlu1 %2728, %v279_v53   ;;  %v3315_v56 = vpop.f32.mrf.mxu0 }
 0x236   : > { %v855_v19 = vmax.f32 %v3313_v54, %v3315_v56 }
 0x237   : > { %v3320_v60 = vpop.f32.mrf.mxu0 }
 0x239   : > { %v3322_v62 = vpop.f32.mrf.mxu0 }
 0x23a   : > { %v858_v13 = vmax.f32 %v3320_v60, %v3322_v62 }
 0x23b   : > { %v3324_v63 = vpop.f32.mrf.mxu0 }
 0x23d   : > { %v3326_v1 = vpop.f32.mrf.mxu0 }
 0x23e   : > { %434 = vperm.xlu0 %2727, %v278_v58   ;;  %v861_v20 = vmax.f32 %v3324_v63, %v3326_v1 }
 0x23f   : > { %v3328_v4 = vpop.f32.mrf.mxu0 }
 0x241   : > { %v3330_v5 = vpop.f32.mrf.mxu0 }
 0x242   : > { %v864_v22 = vmax.f32 %v3328_v4, %v3330_v5 }
 0x243   : > { %v3332_v6 = vpop.f32.mrf.mxu0 }
 0x245   : > { %v3334_v10 = vpop.f32.mrf.mxu0 }
 0x246   : > { %v867_v24 = vmax.f32 %v3332_v6, %v3334_v10 }
 0x247   : > { %v3340_v14 = vpop.f32.mrf.mxu0 }
 0x249   : > { %v3344_v16 = vpop.f32.mrf.mxu0 }
 0x24a   : > { %v870_v26 = vmax.f32 %v3340_v14, %v3344_v16 }
 0x24b   : > { %v3348_v18 = vpop.f32.mrf.mxu0 }
 0x24d   : > { %v3354_v21 = vpop.f32.mrf.mxu0 }
 0x24e   : > { %v873_v30 = vmax.f32 %v3348_v18, %v3354_v21 }
 0x24f   : > { %v3358_v23 = vpop.f32.mrf.mxu0 }
 0x251   : > { %v3362_v25 = vpop.f32.mrf.mxu0 }
 0x252   : > { %v876_v35 = vmax.f32 %v3358_v23, %v3362_v25 }
 0x253   : > { %v3366_v28 = vpop.f32.mrf.mxu0 }
 0x255   : > { %v3370_v31 = vpop.f32.mrf.mxu0 }
 0x256   : > { %v879_v42 = vmax.f32 %v3366_v28, %v3370_v31 }
 0x257   : > { %v3374_v39 = vpop.f32.mrf.mxu0 }
 0x259   : > { %847 = vmax.xlane.f32.xlu1 %v846_v11  ;;  %v3378_v53 = vpop.f32.mrf.mxu0 }
 0x25a   : > { %v882_v58 = vmax.f32 %v3374_v39, %v3378_v53 }
 0x25d   : > { %850 = vmax.xlane.f32.xlu1 %v849_v15  ;;  %859 = vmax.xlane.f32.xlu0 %v858_v13 }
 0x261   : > { %853 = vmax.xlane.f32.xlu1 %v852_v17 }
 0x265   : > { %856 = vmax.xlane.f32.xlu1 %v855_v19 }
 0x269   : > { %862 = vmax.xlane.f32.xlu1 %v861_v20 }
 0x26d   : > { %865 = vmax.xlane.f32.xlu1 %v864_v22 }
 0x271   : > { %868 = vmax.xlane.f32.xlu1 %v867_v24 }
 0x275   : > { %871 = vmax.xlane.f32.xlu1 %v870_v26 }
 0x279   : > { %874 = vmax.xlane.f32.xlu1 %v873_v30 }
 0x27d   : > { %877 = vmax.xlane.f32.xlu1 %v876_v35 }
 0x281   : > { %880 = vmax.xlane.f32.xlu1 %v879_v42 }
 0x285   : > { %883 = vmax.xlane.f32.xlu1 %v882_v58 }
 0x2a9   : > { %v839_v11 = vpop.xlane.xlu1 %838 }
 0x2aa   : > { %v885_v13 = vsub.f32 %v3280_v32, %v839_v11  ;;  %v886_v15 = vsub.f32 %v3282_v33, %v839_v11 }
 0x2ac   : > { %v917_v17 = vmul.f32 1.442695, %v885_v13  ;;  %v919_v19 = vmul.f32 1.442695, %v886_v15 }
 0x2ad   : > { %v842_v20 = vpop.xlane.xlu1 %841 }
 0x2ae   : > { %2731 = vpow2.f32 %v917_v17  ;;  %v887_v22 = vsub.f32 %v3286_v36, %v842_v20  ;;  %v888_v24 = vsub.f32 %v3288_v37, %v842_v20 }
 0x2af   : > { %2733 = vpow2.f32 %v919_v19 }
 0x2b0   : > { %v921_v26 = vmul.f32 1.442695, %v887_v22  ;;  %v923_v30 = vmul.f32 1.442695, %v888_v24 }
 0x2b1   : > { %v3386_v35 = vpop.permute.xlu1 %439  ;;  %v845_v42 = vpop.xlane.xlu0 %844 }
 0x2b2   : > { %2735 = vpow2.f32 %v921_v26  ;;  %v889_v32 = vsub.f32 %v3292_v40, %v845_v42  ;;  %v890_v33 = vsub.f32 %v3294_v41, %v845_v42  ;;  %v581_v58 = vadd.f32 %v3237_v61, %v3386_v35  ;;  %v2498_v61 = vld [vmem:[%s3110_s29 + $0x8] sm:$0xf] }
 0x2b3   : > { %2737 = vpow2.f32 %v923_v30  ;;  %v579_v36 = vadd.f32 %v3234_v59, %v3386_v35 }
 0x2b4   : > { %v925_v37 = vmul.f32 1.442695, %v889_v32  ;;  %v927_v11 = vmul.f32 1.442695, %v890_v33  ;;  %1057 = vmatprep.subr.mxu1 %v581_v58 }
 0x2b5   : > { %1058 = vmatpush1.xpose.msra.mxu1 %v579_v36 }
 0x2b6   : > { %2739 = vpow2.f32 %v925_v37 }
 0x2b7   : > { %2741 = vpow2.f32 %v927_v11 }
 0x2b9   : > { %v3394_v13 = vpop.permute.xlu0 %434 }
 0x2ba   : > { %v573_v40 = vadd.f32 %v3221_v50, %v3394_v13  ;;  %v575_v41 = vadd.f32 %v3228_v55, %v3394_v13 }
 0x2bb   : > { %v2732_v15 = vpop.eup %2731 }
 0x2bc   : > { %v2734_v17 = vpop.eup %2733  ;;  %1059 = vmatprep.subr.mxu1 %v575_v41 }
 0x2bd   : > { %1093 = vmatprep.mubr.f32.mxu1 %v2734_v17  ;;  %1060 = vmatpush1.xpose.msra.mxu1 %v573_v40  ;;  %v3401_v59 = vadd.f32 %v2734_v17, %v2732_v15 }
 0x2be   : > { %2639 = vmatprep.subr.msk.mxu1 %vm323_vm0, %v2498_v61 }
 0x2bf   : > { %v2736_v19 = vpop.eup %2735 }
 0x2c0   : > { %v2738_v20 = vpop.eup %2737  ;;  %1094 = vmatmul.mubr.f32.vlgmr.msra.gmra.mxu1 %v2732_v15 }
 0x2c1   : > { %1098 = vmatprep.mubr.f32.mxu1 %v2738_v20  ;;  %2640 = vmatpush3.msk.msra.mxu1 %vm323_vm0, %v2498_v61  ;;  %v3405_v50 = vadd.f32 %v2738_v20, %v2736_v19 }
 0x2c3   : > { %v2740_v22 = vpop.eup %2739 }
 0x2c4   : > { %v2742_v55 = vpop.eup %2741  ;;  %1099 = vmatmul.mubr.f32.gmra.mxu1 %v2736_v19 }
 0x2c5   : > { %1103 = vmatprep.mubr.f32.mxu1 %v2742_v55  ;;  %v3407_v24 = vadd.f32 %v2742_v55, %v2740_v22 }
 0x2c8   : > { %1104 = vmatmul.mubr.f32.gmra.mxu1 %v2740_v22 }
 0x2e2   : > { %v848_v26 = vpop.xlane.xlu1 %847 }
 0x2e3   : > { %v891_v30 = vsub.f32 %v3298_v44, %v848_v26  ;;  %v892_v42 = vsub.f32 %v3300_v45, %v848_v26 }
 0x2e5   : > { %v929_v32 = vmul.f32 1.442695, %v891_v30  ;;  %v931_v33 = vmul.f32 1.442695, %v892_v42 }
 0x2e6   : > { %v851_v58 = vpop.xlane.xlu1 %850  ;;  %v860_v15 = vpop.xlane.xlu0 %859 }
 0x2e7   : > { %2743 = vpow2.f32 %v929_v32  ;;  %v893_v36 = vsub.f32 %v3302_v47, %v851_v58  ;;  %v894_v37 = vsub.f32 %v3304_v48, %v851_v58  ;;  %v900_v19 = vsub.f32 %v3322_v62, %v860_v15 }
 0x2e8   : > { %2745 = vpow2.f32 %v931_v33  ;;  %v899_v22 = vsub.f32 %v3320_v60, %v860_v15 }
 0x2e9   : > { %v933_v11 = vmul.f32 1.442695, %v893_v36  ;;  %v935_v40 = vmul.f32 1.442695, %v894_v37  ;;  %v947_v30 = vmul.f32 1.442695, %v900_v19 }
 0x2ea   : > { %v854_v41 = vpop.xlane.xlu1 %853  ;;  %v945_v62 = vmul.f32 1.442695, %v899_v22 }
 0x2eb   : > { %2747 = vpow2.f32 %v933_v11  ;;  %v895_v61 = vsub.f32 %v3306_v49, %v854_v41  ;;  %v896_v44 = vsub.f32 %v3308_v52, %v854_v41 }
 0x2ec   : > { %2749 = vpow2.f32 %v935_v40 }
 0x2ed   : > { %v937_v45 = vmul.f32 1.442695, %v895_v61  ;;  %v939_v17 = vmul.f32 1.442695, %v896_v44 }
 0x2ee   : > { %v857_v20 = vpop.xlane.xlu1 %856 }
 0x2ef   : > { %2751 = vpow2.f32 %v937_v45  ;;  %v897_v47 = vsub.f32 %v3313_v54, %v857_v20  ;;  %v898_v48 = vsub.f32 %v3315_v56, %v857_v20 }
 0x2f0   : > { %2753 = vpow2.f32 %v939_v17 }
 0x2f1   : > { %v941_v55 = vmul.f32 1.442695, %v897_v47  ;;  %v943_v26 = vmul.f32 1.442695, %v898_v48 }
 0x2f2   : > { %v863_v49 = vpop.xlane.xlu1 %862 }
 0x2f3   : > { %2755 = vpow2.f32 %v941_v55  ;;  %v902_v52 = vsub.f32 %v3326_v1, %v863_v49  ;;  %v901_v33 = vsub.f32 %v3324_v63, %v863_v49 }
 0x2f4   : > { %v2744_v42 = vpop.eup %2743  ;;  %2757 = vpow2.f32 %v943_v26 }
 0x2f5   : > { %v2746_v32 = vpop.eup %2745  ;;  %2759 = vpow2.f32 %v947_v30  ;;  %v951_v54 = vmul.f32 1.442695, %v902_v52  ;;  %v949_v11 = vmul.f32 1.442695, %v901_v33 }
 0x2f6   : > { %1108 = vmatprep.mubr.f32.mxu1 %v2746_v32  ;;  %v866_v56 = vpop.xlane.xlu1 %865  ;;  %v3421_v58 = vadd.f32 %v2746_v32, %v2744_v42  ;;  %2761 = vpow2.f32 %v945_v62 }
 0x2f7   : > { %v904_v60 = vsub.f32 %v3330_v5, %v866_v56  ;;  %1109 = vmatmul.mubr.f32.gmra.mxu1 %v2744_v42  ;;  %v903_v1 = vsub.f32 %v3328_v4, %v866_v56  ;;  %2763 = vpow2.f32 %v951_v54 }
 0x2f8   : > { %v2748_v36 = vpop.eup %2747  ;;  %2765 = vpow2.f32 %v949_v11 }
 0x2f9   : > { %v2750_v37 = vpop.eup %2749  ;;  %v955_v40 = vmul.f32 1.442695, %v904_v60  ;;  %v953_v5 = vmul.f32 1.442695, %v903_v1 }
 0x2fa   : > { %1113 = vmatprep.mubr.f32.mxu1 %v2750_v37  ;;  %v869_v41 = vpop.xlane.xlu1 %868  ;;  %v3425_v63 = vadd.f32 %v2750_v37, %v2748_v36 }
 0x2fb   : > { %v906_v15 = vsub.f32 %v3334_v10, %v869_v41  ;;  %1114 = vmatmul.mubr.f32.gmra.mxu1 %v2748_v36  ;;  %v905_v45 = vsub.f32 %v3332_v6, %v869_v41  ;;  %2767 = vpow2.f32 %v955_v40 }
 0x2fc   : > { %v2752_v61 = vpop.eup %2751  ;;  %2769 = vpow2.f32 %v953_v5 }
 0x2fd   : > { %v2754_v44 = vpop.eup %2753  ;;  %v959_v17 = vmul.f32 1.442695, %v906_v15  ;;  %v957_v10 = vmul.f32 1.442695, %v905_v45 }
 0x2fe   : > { %1118 = vmatprep.mubr.f32.mxu1 %v2754_v44  ;;  %v872_v19 = vpop.xlane.xlu1 %871  ;;  %v3429_v4 = vadd.f32 %v2754_v44, %v2752_v61 }
 0x2ff   : > { %v908_v20 = vsub.f32 %v3344_v16, %v872_v19  ;;  %1119 = vmatmul.mubr.f32.gmra.mxu1 %v2752_v61  ;;  %v907_v22 = vsub.f32 %v3340_v14, %v872_v19  ;;  %2771 = vpow2.f32 %v959_v17 }
 0x300   : > { %v3432_v47 = vpop.eup %2755  ;;  %2773 = vpow2.f32 %v957_v10 }
 0x301   : > { %v3434_v48 = vpop.eup %2757  ;;  %v963_v55 = vmul.f32 1.442695, %v908_v20  ;;  %v961_v16 = vmul.f32 1.442695, %v907_v22 }
 0x302   : > { %1123 = vmatprep.mubr.f32.mxu1 %v3434_v48  ;;  %v875_v6 = vpop.xlane.xlu1 %874  ;;  %v3438_v26 = vpop.eup %2759 }
 0x303   : > { %v910_v30 = vsub.f32 %v3354_v21, %v875_v6  ;;  %1124 = vmatmul.mubr.f32.gmra.mxu1 %v3432_v47  ;;  %v909_v49 = vsub.f32 %v3348_v18, %v875_v6  ;;  %v3444_v52 = vpop.eup %2761  ;;  %2775 = vpow2.f32 %v963_v55 }
 0x304   : > { %1128 = vmatprep.mubr.f32.mxu1 %v3438_v26  ;;  %v3446_v32 = vpop.eup %2763  ;;  %2777 = vpow2.f32 %v961_v16 }
 0x305   : > { %v967_v14 = vmul.f32 1.442695, %v910_v30  ;;  %v965_v21 = vmul.f32 1.442695, %v909_v49  ;;  %v2766_v54 = vpop.eup %2765 }
 0x306   : > { %v878_v42 = vpop.xlane.xlu1 %877 }
 0x307   : > { %v912_v62 = vsub.f32 %v3362_v25, %v878_v42  ;;  %1129 = vmatmul.mubr.f32.gmra.mxu1 %v3444_v52  ;;  %v911_v33 = vsub.f32 %v3358_v23, %v878_v42  ;;  %2779 = vpow2.f32 %v967_v14  ;;  %v1005_v42 = vadd.f32 %v2766_v54, %v3446_v32 }
 0x308   : > { %1133 = vmatprep.mubr.f32.mxu1 %v3446_v32  ;;  %v3452_v60 = vpop.eup %2767  ;;  %2781 = vpow2.f32 %v965_v21  ;;  %v999_v21 = vadd.f32 %v3434_v48, %v3432_v47 }
 0x309   : > { %v971_v18 = vmul.f32 1.442695, %v912_v62  ;;  %v969_v25 = vmul.f32 1.442695, %v911_v33  ;;  %v2770_v40 = vpop.eup %2769 }
 0x30a   : > { %v881_v56 = vpop.xlane.xlu1 %880  ;;  %v1008_v33 = vadd.f32 %v2770_v40, %v3452_v60 }
 0x30b   : > { %v913_v36 = vsub.f32 %v3366_v28, %v881_v56  ;;  %v914_v37 = vsub.f32 %v3370_v31, %v881_v56  ;;  %1134 = vmatmul.mubr.f32.gmra.mxu1 %v2766_v54  ;;  %2783 = vpow2.f32 %v971_v18 }
 0x30c   : > { %1138 = vmatprep.mubr.f32.mxu1 %v3452_v60  ;;  %v2772_v41 = vpop.eup %2771 }
 0x30d   : > { %v973_v11 = vmul.f32 1.442695, %v913_v36  ;;  %v975_v1 = vmul.f32 1.442695, %v914_v37  ;;  %v2774_v44 = vpop.eup %2773 }
 0x30e   : > { %v884_v23 = vpop.xlane.xlu1 %883  ;;  %v1011_v49 = vadd.f32 %v2774_v44, %v2772_v41 }
 0x30f   : > { %2785 = vpow2.f32 %v973_v11  ;;  %v915_v15 = vsub.f32 %v3374_v39, %v884_v23  ;;  %v916_v61 = vsub.f32 %v3378_v53, %v884_v23  ;;  %1139 = vmatmul.mubr.f32.gmra.mxu1 %v2770_v40 }
 0x310   : > { %2787 = vpow2.f32 %v975_v1  ;;  %1143 = vmatprep.mubr.f32.mxu1 %v2772_v41  ;;  %v2776_v5 = vpop.eup %2775 }
 0x311   : > { %2789 = vpow2.f32 %v969_v25  ;;  %v977_v28 = vmul.f32 1.442695, %v915_v15  ;;  %v979_v31 = vmul.f32 1.442695, %v916_v61  ;;  %v2778_v45 = vpop.eup %2777 }
 0x312   : > { %v1014_v62 = vadd.f32 %v2778_v45, %v2776_v5 }
 0x313   : > { %2791 = vpow2.f32 %v977_v28  ;;  %1144 = vmatmul.mubr.f32.gmra.mxu1 %v2774_v44 }
 0x314   : > { %2793 = vpow2.f32 %v979_v31  ;;  %1148 = vmatprep.mubr.f32.mxu1 %v2776_v5  ;;  %v2780_v17 = vpop.eup %2779 }
 0x315   : > { %v2782_v19 = vpop.eup %2781 }
 0x316   : > { %v1017_v30 = vadd.f32 %v2782_v19, %v2780_v17 }
 0x317   : > { %1149 = vmatmul.mubr.f32.gmra.mxu1 %v2778_v45 }
 0x318   : > { %1153 = vmatprep.mubr.f32.mxu1 %v2780_v17  ;;  %v2784_v39 = vpop.eup %2783 }
 0x31b   : > { %1154 = vmatmul.mubr.f32.gmra.mxu1 %v2782_v19 }
 0x31c   : > { %v2786_v53 = vpop.eup %2785  ;;  %1158 = vmatprep.mubr.f32.mxu1 %v2784_v39 }
 0x31d   : > { %v2788_v20 = vpop.eup %2787 }
 0x31e   : > { %v2790_v10 = vpop.eup %2789  ;;  %v1023_v22 = vadd.f32 %v2788_v20, %v2786_v53 }
 0x31f   : > { %1159 = vmatmul.mubr.f32.gmra.mxu1 %v2790_v10  ;;  %v1020_v14 = vadd.f32 %v2790_v10, %v2784_v39 }
 0x320   : > { %v2792_v55 = vpop.eup %2791  ;;  %1024 = vadd.xlane.f32.xlu1 %v1023_v22  ;;  %1163 = vmatprep.mubr.f32.mxu1 %v2788_v20 }
 0x321   : > { %v2794_v6 = vpop.eup %2793 }
 0x322   : > { %v1026_v16 = vadd.f32 %v2794_v6, %v2792_v55 }
 0x323   : > { %1164 = vmatmul.mubr.f32.gmra.mxu1 %v2786_v53 }
 0x324   : > { %1018 = vadd.xlane.f32.xlu1 %v1017_v30  ;;  %1027 = vadd.xlane.f32.xlu0 %v1026_v16 }
 0x325   : > { %1168 = vmatprep.mubr.f32.mxu1 %v2794_v6 }
 0x327   : > { %1169 = vmatmul.mubr.f32.gmra.mxu1 %v2792_v55 }
 0x328   : > { %1012 = vadd.xlane.f32.xlu1 %v1011_v49  ;;  %1021 = vadd.xlane.f32.xlu0 %v1020_v14 }
 0x329   : > { %2641 = vmatprep.mubr.msk.f32.mxu1 %vm310_vm1, %v3099_v3  ;;  %v1002_v3 = vadd.f32 %v3444_v52, %v3438_v26 }
 0x32b   : > { %2642 = vmatmul.mubr.msk.f32.vlgmr.msra.gmra.mxu1 %vm310_vm1, %v3117_v7 }
 0x32c   : > { %1006 = vadd.xlane.f32.xlu1 %v1005_v42  ;;  %1015 = vadd.xlane.f32.xlu0 %v1014_v62 }
 0x32d   : > { %2644 = vmatprep.mubr.msk.f32.mxu1 %vm310_vm1, %v3124_v8 }
 0x32f   : > { %2645 = vmatmul.mubr.msk.f32.gmra.mxu1 %vm310_vm1, %v3144_v12 }
 0x330   : > { %1000 = vadd.xlane.f32.xlu1 %v999_v21  ;;  %1009 = vadd.xlane.f32.xlu0 %v1008_v33 }
 0x331   : > { %1739 = vmatprep.mubr.f32.mxu1 %v2996_v2 }
 0x334   : > { %994 = vadd.xlane.f32.xlu1 %v3425_v63  ;;  %1003 = vadd.xlane.f32.xlu0 %v1002_v3 }
 0x338   : > { %988 = vadd.xlane.f32.xlu1 %v3407_v24  ;;  %997 = vadd.xlane.f32.xlu0 %v3429_v4 }
 0x33c   : > { %982 = vadd.xlane.f32.xlu1 %v3401_v59  ;;  %991 = vadd.xlane.f32.xlu0 %v3421_v58 }
 0x340   : > { %985 = vadd.xlane.f32.xlu0 %v3405_v50 }
 0x380   : > { %v3480_v7 = vpop.f32.mrf.mxu1 }
 0x382   : > { %v1097_v8 = vpop.f32.mrf.mxu1 }
 0x384   : > { %v3482_v12 = vpop.f32.mrf.mxu1 }
 0x386   : > { %v1102_v47 = vpop.f32.mrf.mxu1 }
 0x388   : > { %v3484_v48 = vpop.f32.mrf.mxu1 }
 0x38a   : > { %v1107_v63 = vpop.f32.mrf.mxu1 }
 0x3a9   : > { %v1025_v37 = vpop.xlane.xlu1 %1024 }
 0x3ad   : > { %v1028_v56 = vpop.xlane.xlu0 %1027  ;;  %v1019_v41 = vpop.xlane.xlu1 %1018 }
 0x3ae   : > { %2795 = vrcp.f32 %v1028_v56 }
 0x3af   : > { %2797 = vrcp.f32 %v1025_v37 }
 0x3b1   : > { %v1022_v1 = vpop.xlane.xlu0 %1021  ;;  %v1013_v19 = vpop.xlane.xlu1 %1012 }
 0x3b2   : > { %2799 = vrcp.f32 %v1022_v1 }
 0x3b3   : > { %2801 = vrcp.f32 %v1019_v41 }
 0x3b5   : > { %v1016_v31 = vpop.xlane.xlu0 %1015  ;;  %v1007_v14 = vpop.xlane.xlu1 %1006 }
 0x3b6   : > { %2803 = vrcp.f32 %v1016_v31 }
 0x3b7   : > { %v3488_v24 = vpop.f32.mrf.mxu1  ;;  %2805 = vrcp.f32 %v1013_v19 }
 0x3b9   : > { %v1112_v59 = vpop.f32.mrf.mxu1  ;;  %v1010_v55 = vpop.xlane.xlu0 %1009 }
 0x3ba   : > { %2807 = vrcp.f32 %v1010_v55 }
 0x3bb   : > { %v3490_v4 = vpop.f32.mrf.mxu1  ;;  %v2796_v28 = vpop.eup %2795  ;;  %2809 = vrcp.f32 %v1007_v14 }
 0x3bc   : > { %v1205_v45 = vmul.f32 %v2796_v28, %v1028_v56  ;;  %v2798_v17 = vpop.eup %2797 }
 0x3bd   : > { %v1117_v58 = vpop.f32.mrf.mxu1  ;;  %v1204_v20 = vmul.f32 %v2798_v17, %v1025_v37  ;;  %v1004_v3 = vpop.xlane.xlu0 %1003 }
 0x3be   : > { %v1221_v10 = vsub.f32 2.0, %v1205_v45  ;;  %2811 = vrcp.f32 %v1004_v3 }
 0x3bf   : > { %v3492_v50 = vpop.f32.mrf.mxu1  ;;  %v2800_v22 = vpop.eup %2799  ;;  %v1220_v16 = vsub.f32 2.0, %v1204_v20 }
 0x3c0   : > { %v1203_v49 = vmul.f32 %v2800_v22, %v1022_v1  ;;  %v1237_v42 = vmul.f32 %v2796_v28, %v1221_v10  ;;  %v2802_v62 = vpop.eup %2801 }
 0x3c1   : > { %v1122_v26 = vpop.f32.mrf.mxu1  ;;  %v1202_v47 = vmul.f32 %v2802_v62, %v1019_v41  ;;  %v1236_v59 = vmul.f32 %v2798_v17, %v1220_v16  ;;  %v998_v28 = vpop.xlane.xlu0 %997 }
 0x3c2   : > { %v1219_v63 = vsub.f32 2.0, %v1203_v49 }
 0x3c3   : > { %v3494_v52 = vpop.f32.mrf.mxu1  ;;  %v2804_v58 = vpop.eup %2803 }
 0x3c4   : > { %v1201_v37 = vmul.f32 %v2804_v58, %v1016_v31 }
 0x3c5   : > { %v1127_v32 = vpop.f32.mrf.mxu1  ;;  %v992_v49 = vpop.xlane.xlu0 %991 }
 0x3c6   : > { %v1001_v32 = vpop.xlane.xlu1 %1000  ;;  %v1217_v45 = vsub.f32 2.0, %v1201_v37 }
 0x3c7   : > { %v3496_v54 = vpop.f32.mrf.mxu1  ;;  %2813 = vrcp.f32 %v1001_v32 }
 0x3c8   : > { %2815 = vrcp.f32 %v998_v28 }
 0x3c9   : > { %v1132_v18 = vpop.f32.mrf.mxu1 }
 0x3ca   : > { %v995_v10 = vpop.xlane.xlu1 %994 }
 0x3cb   : > { %v3498_v60 = vpop.f32.mrf.mxu1  ;;  %2817 = vrcp.f32 %v995_v10 }
 0x3cc   : > { %2819 = vrcp.f32 %v992_v49 }
 0x3cd   : > { %v1137_v36 = vpop.f32.mrf.mxu1 }
 0x3ce   : > { %v1218_v36 = vsub.f32 2.0, %v1202_v47 }
 0x3cf   : > { %v3500_v25 = vpop.f32.mrf.mxu1 }
 0x3d0   : > { %v1234_v17 = vmul.f32 %v2802_v62, %v1218_v36 }
 0x3d1   : > { %v1142_v11 = vpop.f32.mrf.mxu1 }
 0x3d2   : > { %v1235_v11 = vmul.f32 %v2800_v22, %v1219_v63 }
 0x3d3   : > { %v3502_v40 = vpop.f32.mrf.mxu1 }
 0x3d5   : > { %v1147_v23 = vpop.f32.mrf.mxu1 }
 0x3d6   : > { %v2806_v23 = vpop.eup %2805 }
 0x3d7   : > { %v3504_v15 = vpop.f32.mrf.mxu1  ;;  %v2808_v31 = vpop.eup %2807 }
 0x3d9   : > { %v1152_v61 = vpop.f32.mrf.mxu1 }
 0x3db   : > { %v1155_v44 = vpop.f32.mrf.mxu1 }
 0x3dd   : > { %v1157_v5 = vpop.f32.mrf.mxu1 }
 0x3de   : > { %v1200_v5 = vmul.f32 %v2806_v23, %v1013_v19  ;;  %v2810_v19 = vpop.eup %2809 }
 0x3df   : > { %v1160_v39 = vpop.f32.mrf.mxu1  ;;  %v2812_v16 = vpop.eup %2811 }
 0x3e0   : > { %v1251_v61 = vmul.f32 %v1235_v11, %v1160_v39  ;;  %v1216_v22 = vsub.f32 2.0, %v1200_v5  ;;  %v1233_v39 = vmul.f32 %v2804_v58, %v1217_v45  ;;  %v986_v58 = vpop.xlane.xlu0 %985 }
 0x3e1   : > { %v1162_v53 = vpop.f32.mrf.mxu1 }
 0x3e2   : > { %v1232_v62 = vmul.f32 %v2806_v23, %v1216_v22 }
 0x3e3   : > { %v1165_v6 = vpop.f32.mrf.mxu1 }
 0x3e4   : > { %v1252_v18 = vmul.f32 %v1236_v59, %v1165_v6  ;;  %v1199_v6 = vmul.f32 %v2808_v31, %v1010_v55  ;;  %v1197_v55 = vmul.f32 %v2812_v16, %v1004_v3 }
 0x3e5   : > { %v1167_v30 = vpop.f32.mrf.mxu1 }
 0x3e6   : > { %v1213_v63 = vsub.f32 2.0, %v1197_v55  ;;  %v2928_v55 = vld [vmem:[%s3991_s3 + $0x28] sm:$0xff] }
 0x3e7   : > { %v1170_v21 = vpop.f32.mrf.mxu1 }
 0x3e8   : > { %v1253_v33 = vmul.f32 %v1237_v42, %v1170_v21  ;;  %v1198_v42 = vmul.f32 %v2810_v19, %v1007_v14 }
 0x3e9   : > { %v1172_v8 = vpop.f32.mrf.mxu1 }
 0x3ea   : > { %2605 = vmatpush3.xpose.msk.msra.mxu0 %vm627_vm2, %v1253_v33  ;;  %v1248_v33 = vmul.f32 %v1232_v62, %v3502_v40  ;;  %v989_v8 = vpop.xlane.xlu1 %988  ;;  %v2925_v62 = vld [vmem:[%s3991_s3 + $0x10] sm:$0xff] }
 0x3eb   : > { %v2643_v26 = vpop.f32.mrf.mxu1  ;;  %2606 = vmatprep.subr.mxu0 %v2996_v2  ;;  %2821 = vrcp.f32 %v989_v8 }
 0x3ec   : > { %v1463_v53 = vadd.f32 %v2643_v26, %v3208_v34  ;;  %v1249_v34 = vmul.f32 %v1233_v39, %v3504_v15  ;;  %v1214_v15 = vsub.f32 2.0, %v1198_v42  ;;  %2823 = vrcp.f32 %v986_v58 }
 0x3ed   : > { %v1457_v56 = vpop.f32.mrf.mxu1 }
 0x3ee   : > { %v1458_v1 = vadd.f32 %v1457_v56, %v3204_v27  ;;  %2607 = vmatpush3.xpose.msk.msra.mxu0 %vm627_vm2, %v1252_v18  ;;  %v1250_v27 = vmul.f32 %v1234_v17, %v1155_v44  ;;  %v1215_v44 = vsub.f32 2.0, %v1199_v6  ;;  %v1230_v26 = vmul.f32 %v2810_v19, %v1214_v15  ;;  %v983_v18 = vpop.xlane.xlu1 %982 }
 0x3ef   : > { %v2646_v41 = vpop.f32.mrf.mxu1  ;;  %2608 = vmatprep.subr.mxu0 %v2996_v2  ;;  %v1229_v56 = vmul.f32 %v2812_v16, %v1213_v63  ;;  %2825 = vrcp.f32 %v983_v18 }
 0x3f0   : > { %1595 = vxpose.xlu0.b32.start [1/4] (short) %v1458_v1, 128  ;;  %v1473_v21 = vadd.f32 %v2646_v41, %v3211_v38  ;;  %v1231_v47 = vmul.f32 %v2808_v31, %v1215_v44  ;;  %v282_v44 = vld [vmem:[%s3993_s5] sm:$0xf] }
 0x3f1   : > { %v1467_v20 = vpop.f32.mrf.mxu1  ;;  %v1245_v1 = vmul.f32 %v1229_v56, %v3496_v54 }
 0x3f2   : > { %2609 = vmatpush3.xpose.msk.msra.mxu0 %vm627_vm2, %v1251_v61  ;;  %v1468_v30 = vadd.f32 %v1467_v20, %v3206_v29  ;;  %v2814_v29 = vpop.eup %2813  ;;  %v1247_v38 = vmul.f32 %v1231_v47, %v3500_v25 }
 0x3f3   : > { %2610 = vmatprep.subr.mxu0 %v2996_v2  ;;  %v1196_v14 = vmul.f32 %v2814_v29, %v1001_v32  ;;  %v2816_v59 = vpop.eup %2815  ;;  %v1246_v32 = vmul.f32 %v1230_v26, %v3498_v60 }
 0x3f4   : > { %1596 = vxpose.xlu0.b32.cont [2/4] (short) %v1463_v53, 128  ;;  %v1195_v40 = vmul.f32 %v2816_v59, %v998_v28  ;;  %v2818_v36 = vpop.eup %2817 }
 0x3f5   : > { %v1212_v3 = vsub.f32 2.0, %v1196_v14  ;;  %v1194_v25 = vmul.f32 %v2818_v36, %v995_v10  ;;  %v2820_v23 = vpop.eup %2819 }
 0x3f6   : > { %2611 = vmatpush3.xpose.msk.msra.mxu0 %vm627_vm2, %v1250_v27  ;;  %v1211_v37 = vsub.f32 2.0, %v1195_v40  ;;  %v1193_v28 = vmul.f32 %v2820_v23, %v992_v49 }
 0x3f7   : > { %2612 = vmatprep.subr.mxu0 %v2996_v2  ;;  %v1228_v11 = vmul.f32 %v2814_v29, %v1212_v3  ;;  %v1210_v41 = vsub.f32 2.0, %v1194_v25  ;;  %v2927_v29 = vld [vmem:[%s3991_s3 + $0x20] sm:$0xff] }
 0x3f8   : > { %1597 = vxpose.xlu0.b32.cont [3/4] (short) %v1468_v30, 128  ;;  %v1227_v61 = vmul.f32 %v2816_v59, %v1211_v37  ;;  %v2822_v5 = vpop.eup %2821  ;;  %v1209_v54 = vsub.f32 2.0, %v1193_v28 }
 0x3f9   : > { %v1244_v60 = vmul.f32 %v1228_v11, %v3494_v52  ;;  %v1226_v45 = vmul.f32 %v2818_v36, %v1210_v41  ;;  %v1192_v17 = vmul.f32 %v2822_v5, %v989_v8  ;;  %v2824_v31 = vpop.eup %2823  ;;  %v2930_v8 = vld [vmem:[%s3991_s3 + $0x38] sm:$0xff] }
 0x3fa   : > { %2613 = vmatpush3.xpose.msk.msra.mxu0 %vm627_vm2, %v1249_v34  ;;  %v1243_v53 = vmul.f32 %v1227_v61, %v3492_v50  ;;  %v1225_v10 = vmul.f32 %v2820_v23, %v1209_v54  ;;  %v1191_v22 = vmul.f32 %v2824_v31, %v986_v58 }
 0x3fb   : > { %2614 = vmatprep.subr.mxu0 %v2996_v2  ;;  %v1242_v27 = vmul.f32 %v1226_v45, %v3490_v4  ;;  %v1208_v52 = vsub.f32 2.0, %v1192_v17 }
 0x3fc   : > { %1598 = vxpose.xlu0.b32.end [4/4] (short) %v1473_v21, 128  ;;  %v2826_v20 = vpop.eup %2825  ;;  %v1241_v50 = vmul.f32 %v1225_v10, %v3488_v24  ;;  %v1207_v30 = vsub.f32 2.0, %v1191_v22  ;;  %v2496_v24 = vld [vmem:[%s3988_s0 + $0x8] sm:$0xff]  ;;  %v2926_v21 = vld [vmem:[%s3991_s3 + $0x18] sm:$0xff] }
 0x3fd   : > { %v1224_v6 = vmul.f32 %v2822_v5, %v1208_v52  ;;  %v1190_v39 = vmul.f32 %v2826_v20, %v983_v18  ;;  %v1477_v42 = vcombine.high %v2496_v24, %v2496_v24 }
 0x3fe   : > { %2615 = vmatpush3.xpose.msk.msra.mxu0 %vm627_vm2, %v1248_v33  ;;  %v1223_v4 = vmul.f32 %v2824_v31, %v1207_v30  ;;  %v2929_v33 = vld [vmem:[%s3991_s3 + $0x30] sm:$0xff] }
 0x3ff   : > { %2616 = vmatprep.subr.mxu0 %v2996_v2  ;;  %v1240_v19 = vmul.f32 %v1224_v6, %v3484_v48  ;;  %v1206_v34 = vsub.f32 2.0, %v1190_v39 }
 0x400   : > { %v1239_v49 = vmul.f32 %v1223_v4, %v3482_v12  ;;  %v2923_v12 = vld [vmem:[%s3991_s3] sm:$0xff] }
 0x401   : > { %v1222_v16 = vmul.f32 %v2826_v20, %v1206_v34 }
 0x402   : > { %2617 = vmatpush3.xpose.msk.msra.mxu0 %vm627_vm2, %v1247_v38 }
 0x403   : > { %2618 = vmatprep.subr.mxu0 %v2996_v2  ;;  %v1238_v48 = vmul.f32 %v1222_v16, %v3480_v7  ;;  %v2924_v7 = vld [vmem:[%s3991_s3 + $0x8] sm:$0xff] }
 0x406   : > { %2619 = vmatpush3.xpose.msk.msra.mxu0 %vm627_vm2, %v1246_v32 }
 0x407   : > { %2620 = vmatprep.subr.mxu0 %v2996_v2 }
 0x40a   : > { %2621 = vmatpush3.xpose.msk.msra.mxu0 %vm627_vm2, %v1245_v1 }
 0x40b   : > { %2622 = vmatprep.subr.mxu0 %v2996_v2 }
 0x40e   : > { %2623 = vmatpush3.xpose.msk.msra.mxu0 %vm627_vm2, %v1244_v60 }
 0x40f   : > { %2624 = vmatprep.subr.mxu0 %v2996_v2 }
 0x412   : > { %2625 = vmatpush3.xpose.msk.msra.mxu0 %vm627_vm2, %v1243_v53 }
 0x413   : > { %2626 = vmatprep.subr.mxu0 %v2996_v2 }
 0x416   : > { %2627 = vmatpush3.xpose.msk.msra.mxu0 %vm627_vm2, %v1242_v27 }
 0x417   : > { %2628 = vmatprep.subr.mxu0 %v2996_v2 }
 0x41a   : > { %2629 = vmatpush3.xpose.msk.msra.mxu0 %vm627_vm2, %v1241_v50 }
 0x41b   : > { %2630 = vmatprep.subr.mxu0 %v2996_v2 }
 0x41e   : > { %2631 = vmatpush3.xpose.msk.msra.mxu0 %vm627_vm2, %v1240_v19 }
 0x41f   : > { %2632 = vmatprep.subr.mxu0 %v2996_v2 }
 0x422   : > { %2633 = vmatpush3.xpose.msk.msra.mxu0 %vm627_vm2, %v1239_v49 }
 0x423   : > { %2634 = vmatprep.subr.mxu0 %v2996_v2 }
 0x426   : > { %2635 = vmatpush3.xpose.msk.msra.mxu0 %vm627_vm2, %v1238_v48 }
 0x427   : > { %2504 = vmatprep.subr.msk.mxu0 %vm323_vm0, %v1477_v42 }
 0x429   : > { %2637 = vmatmul.mubr.msk.f32.vlgmr.msra.gmra.mxu0 %vm627_vm2, %v282_v44 }
 0x42a   : > { %2505 = vmatpush1.msk.msra.mxu0 %vm323_vm0, %v2496_v24  ;;  %1546 = vmatprep.mubr.f32.mxu0 %v2996_v2 }
 0x42d   : > { %2506 = vmatmul.mubr.msk.f32.vlgmr.msra.gmra.mxu0 %vm310_vm1, %v2923_v12 }
 0x42e   : > { %1552 = vmatprep.mubr.f32.mxu0 %v2996_v2 }
 0x431   : > { %2507 = vmatmul.mubr.msk.f32.gmra.mxu0 %vm310_vm1, %v2924_v7 }
 0x432   : > { %1558 = vmatprep.mubr.f32.mxu0 %v2996_v2 }
 0x435   : > { %2508 = vmatmul.mubr.msk.f32.gmra.mxu0 %vm310_vm1, %v2925_v62 }
 0x436   : > { %1564 = vmatprep.mubr.f32.mxu0 %v2996_v2 }
 0x439   : > { %2509 = vmatmul.mubr.msk.f32.gmra.mxu0 %vm310_vm1, %v2926_v21 }
 0x43a   : > { %1570 = vmatprep.mubr.f32.mxu0 %v2996_v2 }
 0x43d   : > { %2510 = vmatmul.mubr.msk.f32.gmra.mxu0 %vm310_vm1, %v2927_v29 }
 0x43e   : > { %1576 = vmatprep.mubr.f32.mxu0 %v2996_v2 }
 0x441   : > { %2511 = vmatmul.mubr.msk.f32.gmra.mxu0 %vm310_vm1, %v2928_v55 }
 0x442   : > { %1582 = vmatprep.mubr.f32.mxu0 %v2996_v2 }
 0x445   : > { %2512 = vmatmul.mubr.msk.f32.gmra.mxu0 %vm310_vm1, %v2929_v33 }
 0x446   : > { %1588 = vmatprep.mubr.f32.mxu0 %v2996_v2 }
 0x449   : > { %2513 = vmatmul.mubr.msk.f32.gmra.mxu0 %vm310_vm1, %v2930_v8 }
 0x46c   : > { %v1611_v15 = vpop.trf.xlu0 }
 0x470   : > { %v1612_v63 = vpop.trf.xlu0 }
 0x474   : > { %v1613_v26 = vpop.trf.xlu0 }
 0x478   : > { %v1614_v56 = vpop.trf.xlu0 }
 0x47c   : > { %v1615_v1 = vpop.trf.xlu0 }
 0x480   : > { %v1616_v53 = vpop.trf.xlu0 }
 0x484   : > { %v1617_v31 = vpop.trf.xlu0 }
 0x488   : > { %v1618_v10 = vpop.trf.xlu0 }
 0x48c   : > { %v1619_v39 = vpop.trf.xlu0 }
 0x490   : > { %v1620_v30 = vpop.trf.xlu0 }
 0x4e9   : > { %v3602_v47 = vpop.f32.mrf.mxu0 }
 0x4eb   : > { %v2638_v14 = vpop.f32.mrf.mxu0 }
 0x4ed   : > { %v1548_v38 = vpop.f32.mrf.mxu0 }
 0x4ef   : > { %v1550_v59 = vpop.f32.mrf.mxu0 }
 0x4f0   : > { %v1551_v45 = vadd.f32 %v1550_v59, %v3231_v57 }
 0x4f1   : > { %v1554_v58 = vpop.f32.mrf.mxu0 }
 0x4f2   : > { %v1555_v28 = vadd.f32 %v1554_v58, %v3223_v51 }
 0x4f3   : > { %v1556_v3 = vpop.f32.mrf.mxu0 }
 0x4f4   : > { %v1557_v60 = vadd.f32 %v1556_v3, %v3223_v51 }
 0x4f5   : > { %v1560_v40 = vpop.f32.mrf.mxu0 }
 0x4f6   : > { %v1561_v41 = vadd.f32 %v1560_v40, %v3217_v46 }
 0x4f7   : > { %v1562_v18 = vpop.f32.mrf.mxu0 }
 0x4f8   : > { %v1563_v23 = vadd.f32 %v1562_v18, %v3217_v46 }
 0x4f9   : > { %v1566_v32 = vpop.f32.mrf.mxu0 }
 0x4fa   : > { %v1567_v37 = vadd.f32 %v1566_v32, %v3214_v43 }
 0x4fb   : > { %v1568_v36 = vpop.f32.mrf.mxu0 }
 0x4fc   : > { %v1569_v25 = vadd.f32 %v1568_v36, %v3214_v43  ;;  %v1549_v43 = vadd.f32 %v1548_v38, %v3231_v57 }
 0x4fd   : > { %v1572_v11 = vpop.f32.mrf.mxu0 }
 0x4fe   : > { %1699 = vmatprep.subr.mxu1 %v1569_v25 }
 0x4ff   : > { %v1574_v61 = vpop.f32.mrf.mxu0  ;;  %1700 = vmatpush1.msra.mxu1 %v1567_v37 }
 0x500   : > { %1701 = vmatprep.subr.mxu1 %v1563_v23  ;;  %v1575_v50 = vadd.f32 %v1574_v61, %v3394_v13 }
 0x501   : > { %v1578_v5 = vpop.f32.mrf.mxu0  ;;  %1702 = vmatpush1.msra.mxu1 %v1561_v41 }
 0x502   : > { %1703 = vmatprep.subr.mxu1 %v1557_v60 }
 0x503   : > { %v1580_v17 = vpop.f32.mrf.mxu0  ;;  %1704 = vmatpush1.msra.mxu1 %v1555_v28 }
 0x504   : > { %1705 = vmatprep.subr.mxu1 %v1551_v45  ;;  %v1581_v6 = vadd.f32 %v1580_v17, %v3386_v35 }
 0x505   : > { %v1584_v54 = vpop.f32.mrf.mxu0  ;;  %1706 = vmatpush1.msra.mxu1 %v1549_v43 }
 0x506   : > { %2514 = vmatmul.mubr.msk.f32.vlgmr.msra.gmra.mxu1 %vm627_vm2, %v1611_v15  ;;  %2647 = vmatprep.subr.mxu1 %v2996_v2  ;;  %v1585_v22 = vadd.f32 %v1584_v54, %v3244_v9 }
 0x507   : > { %v1586_v46 = vpop.f32.mrf.mxu0  ;;  %1745 = vmatprep.mubr.f32.mxu1 %v2996_v2 }
 0x508   : > { %v1587_v52 = vadd.f32 %v1586_v46, %v3244_v9  ;;  %v1573_v9 = vadd.f32 %v1572_v11, %v3394_v13 }
 0x509   : > { %v1590_v51 = vpop.f32.mrf.mxu0 }
 0x50a   : > { %2515 = vmatmul.mubr.msk.f32.gmra.mxu1 %vm627_vm2, %v1612_v63  ;;  %v1591_v27 = vadd.f32 %v1590_v51, %v3241_v0 }
 0x50b   : > { %v1592_v20 = vpop.f32.mrf.mxu0  ;;  %1751 = vmatprep.mubr.f32.mxu1 %v2996_v2 }
 0x50c   : > { %v1593_v57 = vadd.f32 %v1592_v20, %v3241_v0  ;;  %v1579_v0 = vadd.f32 %v1578_v5, %v3386_v35  ;;  %v1621_v35 = vpop.trf.xlu0 }
 0x50e   : > { %2516 = vmatmul.mubr.msk.f32.gmra.mxu1 %vm627_vm2, %v1613_v26  ;;  %2052 = vmatprep.subr.mxu0 %v1593_v57 }
 0x50f   : > { %2053 = vmatpush1.xpose.msra.mxu0 %v1591_v27  ;;  %1757 = vmatprep.mubr.f32.mxu1 %v2996_v2 }
 0x510   : > { %2054 = vmatprep.subr.mxu0 %v1587_v52  ;;  %v1622_v13 = vpop.trf.xlu0 }
 0x512   : > { %2517 = vmatmul.mubr.msk.f32.gmra.mxu1 %vm627_vm2, %v1614_v56 }
 0x513   : > { %2055 = vmatpush1.xpose.msra.mxu0 %v1585_v22  ;;  %1763 = vmatprep.mubr.f32.mxu1 %v2996_v2 }
 0x514   : > { %2056 = vmatprep.subr.mxu0 %v1581_v6  ;;  %v1623_v19 = vpop.trf.xlu0 }
 0x516   : > { %2518 = vmatmul.mubr.msk.f32.gmra.mxu1 %vm627_vm2, %v1615_v1 }
 0x517   : > { %2057 = vmatpush1.xpose.msra.mxu0 %v1579_v0  ;;  %1769 = vmatprep.mubr.f32.mxu1 %v2996_v2 }
 0x518   : > { %2058 = vmatprep.subr.mxu0 %v1575_v50  ;;  %v1624_v34 = vpop.trf.xlu0 }
 0x51a   : > { %2519 = vmatmul.mubr.msk.f32.gmra.mxu1 %vm627_vm2, %v1616_v53 }
 0x51b   : > { %2059 = vmatpush1.xpose.msra.mxu0 %v1573_v9  ;;  %1775 = vmatprep.mubr.f32.mxu1 %v2996_v2 }
 0x51c   : > { %v1625_v4 = vpop.trf.xlu0 }
 0x51e   : > { %2520 = vmatmul.mubr.msk.f32.gmra.mxu1 %vm627_vm2, %v1617_v31 }
 0x51f   : > { %1781 = vmatprep.mubr.f32.mxu1 %v2996_v2 }
 0x520   : > { %v1626_v16 = vpop.trf.xlu0 }
 0x522   : > { %2521 = vmatmul.mubr.msk.f32.gmra.mxu1 %vm627_vm2, %v1618_v10 }
 0x523   : > { %1787 = vmatprep.mubr.f32.mxu1 %v2996_v2 }
 0x526   : > { %2522 = vmatmul.mubr.msk.f32.gmra.mxu1 %vm627_vm2, %v1619_v39 }
 0x527   : > { %1793 = vmatprep.mubr.f32.mxu1 %v2996_v2 }
 0x52a   : > { %2523 = vmatmul.mubr.msk.f32.gmra.mxu1 %vm627_vm2, %v1620_v30 }
 0x52b   : > { %1799 = vmatprep.mubr.f32.mxu1 %v2996_v2 }
 0x52e   : > { %2524 = vmatmul.mubr.msk.f32.gmra.mxu1 %vm627_vm2, %v1621_v35 }
 0x52f   : > { %1805 = vmatprep.mubr.f32.mxu1 %v2996_v2 }
 0x532   : > { %2525 = vmatmul.mubr.msk.f32.gmra.mxu1 %vm627_vm2, %v1622_v13 }
 0x533   : > { %1811 = vmatprep.mubr.f32.mxu1 %v2996_v2 }
 0x536   : > { %2526 = vmatmul.mubr.msk.f32.gmra.mxu1 %vm627_vm2, %v1623_v19 }
 0x537   : > { %1817 = vmatprep.mubr.f32.mxu1 %v2996_v2 }
 0x53a   : > { %2527 = vmatmul.mubr.msk.f32.gmra.mxu1 %vm627_vm2, %v1624_v34 }
 0x53b   : > { %1823 = vmatprep.mubr.f32.mxu1 %v2996_v2 }
 0x53e   : > { %2528 = vmatmul.mubr.msk.f32.gmra.mxu1 %vm627_vm2, %v1625_v4 }
 0x53f   : > { %1829 = vmatprep.mubr.f32.mxu1 %v2996_v2 }
 0x542   : > { %2529 = vmatmul.mubr.msk.f32.gmra.mxu1 %vm627_vm2, %v1626_v16 }
 0x543   : > { %2679 = vmatprep.mubr.msk.f32.mxu1 %vm2998_vm3, %v2996_v2 }
 0x5c6   : > { %v3654_v49 = vpop.f32.mrf.mxu1 }
 0x5c8   : > { %v3656_v24 = vpop.f32.mrf.mxu1 }
 0x5c9   : > { %v1836_v42 = vmax.f32 %v3654_v49, %v3656_v24 }
 0x5ca   : > { %v3660_v48 = vpop.f32.mrf.mxu1 }
 0x5cb   : > { %1837 = vmax.xlane.f32.xlu1 %v1836_v42 }
 0x5cc   : > { %v3662_v44 = vpop.f32.mrf.mxu1 }
 0x5cd   : > { %v1839_v12 = vmax.f32 %v3660_v48, %v3662_v44 }
 0x5ce   : > { %v3666_v7 = vpop.f32.mrf.mxu1 }
 0x5cf   : > { %1840 = vmax.xlane.f32.xlu1 %v1839_v12 }
 0x5d0   : > { %v3668_v62 = vpop.f32.mrf.mxu1 }
 0x5d1   : > { %v1842_v21 = vmax.f32 %v3666_v7, %v3668_v62 }
 0x5d2   : > { %v3672_v29 = vpop.f32.mrf.mxu1 }
 0x5d3   : > { %1843 = vmax.xlane.f32.xlu1 %v1842_v21 }
 0x5d4   : > { %v3674_v55 = vpop.f32.mrf.mxu1 }
 0x5d5   : > { %v1845_v33 = vmax.f32 %v3672_v29, %v3674_v55 }
 0x5d6   : > { %v3678_v8 = vpop.f32.mrf.mxu1 }
 0x5d7   : > { %1846 = vmax.xlane.f32.xlu1 %v1845_v33 }
 0x5d8   : > { %v3680_v15 = vpop.f32.mrf.mxu1 }
 0x5d9   : > { %v1848_v14 = vmax.f32 %v3678_v8, %v3680_v15 }
 0x5da   : > { %v3684_v63 = vpop.f32.mrf.mxu1 }
 0x5db   : > { %1849 = vmax.xlane.f32.xlu1 %v1848_v14 }
 0x5dc   : > { %v3686_v38 = vpop.f32.mrf.mxu1 }
 0x5dd   : > { %v1851_v59 = vmax.f32 %v3684_v63, %v3686_v38 }
 0x5de   : > { %v3690_v58 = vpop.f32.mrf.mxu1 }
 0x5df   : > { %1852 = vmax.xlane.f32.xlu1 %v1851_v59 }
 0x5e0   : > { %v3692_v26 = vpop.f32.mrf.mxu1 }
 0x5e1   : > { %v1854_v3 = vmax.f32 %v3690_v58, %v3692_v26 }
 0x5e2   : > { %v3696_v40 = vpop.f32.mrf.mxu1 }
 0x5e3   : > { %1855 = vmax.xlane.f32.xlu1 %v1854_v3 }
 0x5e4   : > { %v3698_v18 = vpop.f32.mrf.mxu1 }
 0x5e5   : > { %v1857_v56 = vmax.f32 %v3696_v40, %v3698_v18 }
 0x5e6   : > { %v3702_v32 = vpop.f32.mrf.mxu1 }
 0x5e7   : > { %1858 = vmax.xlane.f32.xlu1 %v1857_v56 }
 0x5e8   : > { %v3704_v36 = vpop.f32.mrf.mxu1 }
 0x5e9   : > { %v1860_v25 = vmax.f32 %v3702_v32, %v3704_v36 }
 0x5ea   : > { %v3708_v37 = vpop.f32.mrf.mxu1 }
 0x5eb   : > { %1861 = vmax.xlane.f32.xlu1 %v1860_v25 }
 0x5ec   : > { %v3710_v11 = vpop.f32.mrf.mxu1 }
 0x5ed   : > { %v1863_v1 = vmax.f32 %v3708_v37, %v3710_v11 }
 0x5ee   : > { %v3714_v23 = vpop.f32.mrf.mxu1 }
 0x5ef   : > { %1864 = vmax.xlane.f32.xlu1 %v1863_v1 }
 0x5f0   : > { %v3716_v41 = vpop.f32.mrf.mxu1 }
 0x5f1   : > { %v1866_v61 = vmax.f32 %v3714_v23, %v3716_v41 }
 0x5f2   : > { %v3720_v60 = vpop.f32.mrf.mxu1 }
 0x5f3   : > { %1867 = vmax.xlane.f32.xlu1 %v1866_v61 }
 0x5f4   : > { %v3722_v28 = vpop.f32.mrf.mxu1 }
 0x5f5   : > { %v1869_v5 = vmax.f32 %v3720_v60, %v3722_v28 }
 0x5f6   : > { %v3726_v45 = vpop.f32.mrf.mxu1 }
 0x5f7   : > { %1870 = vmax.xlane.f32.xlu1 %v1869_v5 }
 0x5f8   : > { %v3728_v43 = vpop.f32.mrf.mxu1 }
 0x5f9   : > { %v1872_v17 = vmax.f32 %v3726_v45, %v3728_v43 }
 0x5fa   : > { %v3732_v53 = vpop.f32.mrf.mxu1 }
 0x5fb   : > { %1873 = vmax.xlane.f32.xlu1 %v1872_v17 }
 0x5fc   : > { %v3734_v54 = vpop.f32.mrf.mxu1 }
 0x5fd   : > { %v1875_v46 = vmax.f32 %v3732_v53, %v3734_v54 }
 0x5fe   : > { %v3738_v51 = vpop.f32.mrf.mxu1 }
 0x5ff   : > { %1876 = vmax.xlane.f32.xlu1 %v1875_v46 }
 0x600   : > { %v3740_v31 = vpop.f32.mrf.mxu1 }
 0x601   : > { %v1878_v20 = vmax.f32 %v3738_v51, %v3740_v31 }
 0x602   : > { %v3744_v57 = vpop.f32.mrf.mxu1 }
 0x603   : > { %1879 = vmax.xlane.f32.xlu0 %v1878_v20 }
 0x604   : > { %v3746_v27 = vpop.f32.mrf.mxu1 }
 0x605   : > { %v1881_v52 = vmax.f32 %v3744_v57, %v3746_v27 }
 0x607   : > { %1882 = vmax.xlane.f32.xlu1 %v1881_v52 }
 0x654   : > { %v1838_v10 = vpop.xlane.xlu1 %1837 }
 0x655   : > { %v1884_v22 = vsub.f32 %v3654_v49, %v1838_v10  ;;  %v1885_v6 = vsub.f32 %v3656_v24, %v1838_v10 }
 0x657   : > { %v1916_v0 = vmul.f32 1.442695, %v1884_v22  ;;  %v1918_v39 = vmul.f32 1.442695, %v1885_v6 }
 0x658   : > { %v1841_v50 = vpop.xlane.xlu1 %1840 }
 0x659   : > { %2827 = vpow2.f32 %v1916_v0  ;;  %v1886_v9 = vsub.f32 %v3660_v48, %v1841_v50  ;;  %v1887_v30 = vsub.f32 %v3662_v44, %v1841_v50 }
 0x65a   : > { %2829 = vpow2.f32 %v1918_v39 }
 0x65b   : > { %v1920_v35 = vmul.f32 1.442695, %v1886_v9  ;;  %v1922_v13 = vmul.f32 1.442695, %v1887_v30 }
 0x65c   : > { %v1844_v19 = vpop.xlane.xlu1 %1843 }
 0x65d   : > { %2831 = vpow2.f32 %v1920_v35  ;;  %v1888_v34 = vsub.f32 %v3666_v7, %v1844_v19  ;;  %v1889_v4 = vsub.f32 %v3668_v62, %v1844_v19 }
 0x65e   : > { %2833 = vpow2.f32 %v1922_v13 }
 0x65f   : > { %v1924_v16 = vmul.f32 1.442695, %v1888_v34  ;;  %v1926_v49 = vmul.f32 1.442695, %v1889_v4 }
 0x660   : > { %v1847_v24 = vpop.xlane.xlu1 %1846 }
 0x661   : > { %2835 = vpow2.f32 %v1924_v16  ;;  %v1890_v42 = vsub.f32 %v3672_v29, %v1847_v24  ;;  %v1891_v48 = vsub.f32 %v3674_v55, %v1847_v24 }
 0x662   : > { %2837 = vpow2.f32 %v1926_v49 }
 0x663   : > { %v1928_v44 = vmul.f32 1.442695, %v1890_v42  ;;  %v1930_v12 = vmul.f32 1.442695, %v1891_v48 }
 0x664   : > { %v1850_v21 = vpop.xlane.xlu1 %1849 }
 0x665   : > { %2839 = vpow2.f32 %v1928_v44  ;;  %v1892_v33 = vsub.f32 %v3678_v8, %v1850_v21  ;;  %v1893_v7 = vsub.f32 %v3680_v15, %v1850_v21 }
 0x666   : > { %v2828_v14 = vpop.eup %2827  ;;  %2841 = vpow2.f32 %v1930_v12 }
 0x667   : > { %v2830_v62 = vpop.eup %2829  ;;  %v1932_v59 = vmul.f32 1.442695, %v1892_v33  ;;  %v1934_v3 = vmul.f32 1.442695, %v1893_v7 }
 0x668   : > { %2092 = vmatprep.mubr.f32.mxu0 %v2830_v62  ;;  %v1853_v56 = vpop.xlane.xlu1 %1852  ;;  %v3760_v25 = vadd.f32 %v2830_v62, %v2828_v14 }
 0x669   : > { %2843 = vpow2.f32 %v1932_v59  ;;  %2093 = vmatmul.mubr.f32.vlgmr.msra.gmra.mxu0 %v2828_v14  ;;  %v1894_v29 = vsub.f32 %v3684_v63, %v1853_v56  ;;  %v1895_v55 = vsub.f32 %v3686_v38, %v1853_v56 }
 0x66a   : > { %v2832_v1 = vpop.eup %2831  ;;  %2845 = vpow2.f32 %v1934_v3 }
 0x66b   : > { %v2834_v8 = vpop.eup %2833  ;;  %v1936_v61 = vmul.f32 1.442695, %v1894_v29  ;;  %v1938_v15 = vmul.f32 1.442695, %v1895_v55 }
 0x66c   : > { %2097 = vmatprep.mubr.f32.mxu0 %v2834_v8  ;;  %v1856_v5 = vpop.xlane.xlu1 %1855  ;;  %v3764_v17 = vadd.f32 %v2834_v8, %v2832_v1 }
 0x66d   : > { %2847 = vpow2.f32 %v1936_v61  ;;  %2098 = vmatmul.mubr.f32.gmra.mxu0 %v2832_v1  ;;  %v1896_v46 = vsub.f32 %v3690_v58, %v1856_v5  ;;  %v1897_v20 = vsub.f32 %v3692_v26, %v1856_v5 }
 0x66e   : > { %v2836_v52 = vpop.eup %2835  ;;  %2849 = vpow2.f32 %v1938_v15 }
 0x66f   : > { %v2838_v63 = vpop.eup %2837  ;;  %v1940_v10 = vmul.f32 1.442695, %v1896_v46  ;;  %v1942_v38 = vmul.f32 1.442695, %v1897_v20 }
 0x670   : > { %2102 = vmatprep.mubr.f32.mxu0 %v2838_v63  ;;  %v1859_v22 = vpop.xlane.xlu1 %1858  ;;  %v3768_v6 = vadd.f32 %v2838_v63, %v2836_v52 }
 0x671   : > { %2851 = vpow2.f32 %v1940_v10  ;;  %2103 = vmatmul.mubr.f32.gmra.mxu0 %v2836_v52  ;;  %v1898_v0 = vsub.f32 %v3696_v40, %v1859_v22  ;;  %v1899_v39 = vsub.f32 %v3698_v18, %v1859_v22 }
 0x672   : > { %v2840_v50 = vpop.eup %2839  ;;  %2853 = vpow2.f32 %v1942_v38 }
 0x673   : > { %v2842_v58 = vpop.eup %2841  ;;  %v1944_v9 = vmul.f32 1.442695, %v1898_v0  ;;  %v1946_v26 = vmul.f32 1.442695, %v1899_v39 }
 0x674   : > { %2107 = vmatprep.mubr.f32.mxu0 %v2842_v58  ;;  %v1862_v30 = vpop.xlane.xlu1 %1861  ;;  %v3772_v35 = vadd.f32 %v2842_v58, %v2840_v50 }
 0x675   : > { %2855 = vpow2.f32 %v1944_v9  ;;  %2108 = vmatmul.mubr.f32.gmra.mxu0 %v2840_v50  ;;  %v1900_v13 = vsub.f32 %v3702_v32, %v1862_v30  ;;  %v1901_v19 = vsub.f32 %v3704_v36, %v1862_v30 }
 0x676   : > { %v2844_v34 = vpop.eup %2843  ;;  %2857 = vpow2.f32 %v1946_v26 }
 0x677   : > { %v2846_v40 = vpop.eup %2845  ;;  %v1948_v4 = vmul.f32 1.442695, %v1900_v13  ;;  %v1950_v18 = vmul.f32 1.442695, %v1901_v19 }
 0x678   : > { %2112 = vmatprep.mubr.f32.mxu0 %v2846_v40  ;;  %v1865_v16 = vpop.xlane.xlu1 %1864  ;;  %v3776_v49 = vadd.f32 %v2846_v40, %v2844_v34 }
 0x679   : > { %2859 = vpow2.f32 %v1948_v4  ;;  %2113 = vmatmul.mubr.f32.gmra.mxu0 %v2844_v34  ;;  %v1902_v24 = vsub.f32 %v3708_v37, %v1865_v16  ;;  %v1903_v42 = vsub.f32 %v3710_v11, %v1865_v16 }
 0x67a   : > { %v2848_v48 = vpop.eup %2847  ;;  %2861 = vpow2.f32 %v1950_v18 }
 0x67b   : > { %v2850_v32 = vpop.eup %2849  ;;  %v1952_v44 = vmul.f32 1.442695, %v1902_v24  ;;  %v1954_v36 = vmul.f32 1.442695, %v1903_v42 }
 0x67c   : > { %2117 = vmatprep.mubr.f32.mxu0 %v2850_v32  ;;  %v1868_v12 = vpop.xlane.xlu1 %1867  ;;  %v3780_v21 = vadd.f32 %v2850_v32, %v2848_v48 }
 0x67d   : > { %2863 = vpow2.f32 %v1952_v44  ;;  %2118 = vmatmul.mubr.f32.gmra.mxu0 %v2848_v48  ;;  %v1904_v33 = vsub.f32 %v3714_v23, %v1868_v12  ;;  %v1905_v7 = vsub.f32 %v3716_v41, %v1868_v12 }
 0x67e   : > { %v2852_v14 = vpop.eup %2851  ;;  %2865 = vpow2.f32 %v1954_v36 }
 0x67f   : > { %v2854_v37 = vpop.eup %2853  ;;  %v1956_v62 = vmul.f32 1.442695, %v1904_v33  ;;  %v1958_v11 = vmul.f32 1.442695, %v1905_v7 }
 0x680   : > { %2122 = vmatprep.mubr.f32.mxu0 %v2854_v37  ;;  %v1871_v59 = vpop.xlane.xlu1 %1870  ;;  %v3784_v3 = vadd.f32 %v2854_v37, %v2852_v14  ;;  %v283_v37 = vld [vmem:[%s3994_s6] sm:$0xf] }
 0x681   : > { %2867 = vpow2.f32 %v1956_v62  ;;  %2123 = vmatmul.mubr.f32.gmra.mxu0 %v2852_v14  ;;  %v1906_v56 = vsub.f32 %v3720_v60, %v1871_v59  ;;  %v1907_v29 = vsub.f32 %v3722_v28, %v1871_v59 }
 0x682   : > { %v2856_v55 = vpop.eup %2855  ;;  %2869 = vpow2.f32 %v1958_v11 }
 0x683   : > { %v2858_v23 = vpop.eup %2857  ;;  %v1960_v1 = vmul.f32 1.442695, %v1906_v56  ;;  %v1962_v41 = vmul.f32 1.442695, %v1907_v29 }
 0x684   : > { %2127 = vmatprep.mubr.f32.mxu0 %v2858_v23  ;;  %v1874_v8 = vpop.xlane.xlu1 %1873  ;;  %v3788_v61 = vadd.f32 %v2858_v23, %v2856_v55 }
 0x685   : > { %2871 = vpow2.f32 %v1960_v1  ;;  %2128 = vmatmul.mubr.f32.gmra.mxu0 %v2856_v55  ;;  %v1908_v15 = vsub.f32 %v3726_v45, %v1874_v8  ;;  %v1909_v5 = vsub.f32 %v3728_v43, %v1874_v8 }
 0x686   : > { %v2860_v46 = vpop.eup %2859  ;;  %2873 = vpow2.f32 %v1962_v41 }
 0x687   : > { %v2862_v60 = vpop.eup %2861  ;;  %v1964_v20 = vmul.f32 1.442695, %v1908_v15  ;;  %v1966_v28 = vmul.f32 1.442695, %v1909_v5 }
 0x688   : > { %2132 = vmatprep.mubr.f32.mxu0 %v2862_v60  ;;  %v1877_v52 = vpop.xlane.xlu1 %1876  ;;  %v3792_v63 = vadd.f32 %v2862_v60, %v2860_v46 }
 0x689   : > { %2875 = vpow2.f32 %v1964_v20  ;;  %2133 = vmatmul.mubr.f32.gmra.mxu0 %v2860_v46  ;;  %v1910_v10 = vsub.f32 %v3732_v53, %v1877_v52  ;;  %v1911_v38 = vsub.f32 %v3734_v54, %v1877_v52 }
 0x68a   : > { %v2864_v22 = vpop.eup %2863  ;;  %2877 = vpow2.f32 %v1966_v28 }
 0x68b   : > { %v2866_v45 = vpop.eup %2865  ;;  %v1968_v0 = vmul.f32 1.442695, %v1910_v10  ;;  %v1970_v43 = vmul.f32 1.442695, %v1911_v38 }
 0x68c   : > { %2137 = vmatprep.mubr.f32.mxu0 %v2866_v45  ;;  %v1880_v39 = vpop.xlane.xlu0 %1879  ;;  %v2007_v14 = vadd.f32 %v2866_v45, %v2864_v22 }
 0x68d   : > { %2879 = vpow2.f32 %v1968_v0  ;;  %2138 = vmatmul.mubr.f32.gmra.mxu0 %v2864_v22  ;;  %v1912_v50 = vsub.f32 %v3738_v51, %v1880_v39  ;;  %v1913_v58 = vsub.f32 %v3740_v31, %v1880_v39 }
 0x68e   : > { %v2868_v9 = vpop.eup %2867  ;;  %2881 = vpow2.f32 %v1970_v43 }
 0x68f   : > { %v2870_v26 = vpop.eup %2869  ;;  %v1972_v30 = vmul.f32 1.442695, %v1912_v50  ;;  %v1974_v53 = vmul.f32 1.442695, %v1913_v58 }
 0x690   : > { %2142 = vmatprep.mubr.f32.mxu0 %v2870_v26  ;;  %v1883_v54 = vpop.xlane.xlu1 %1882  ;;  %v2010_v7 = vadd.f32 %v2870_v26, %v2868_v9 }
 0x691   : > { %2883 = vpow2.f32 %v1972_v30  ;;  %2143 = vmatmul.mubr.f32.gmra.mxu0 %v2868_v9  ;;  %v1914_v13 = vsub.f32 %v3744_v57, %v1883_v54  ;;  %v1915_v19 = vsub.f32 %v3746_v27, %v1883_v54 }
 0x692   : > { %v2872_v34 = vpop.eup %2871  ;;  %2885 = vpow2.f32 %v1974_v53 }
 0x693   : > { %v2874_v40 = vpop.eup %2873  ;;  %v1976_v4 = vmul.f32 1.442695, %v1914_v13  ;;  %v1978_v51 = vmul.f32 1.442695, %v1915_v19 }
 0x694   : > { %2147 = vmatprep.mubr.f32.mxu0 %v2874_v40  ;;  %v2013_v33 = vadd.f32 %v2874_v40, %v2872_v34 }
 0x695   : > { %2887 = vpow2.f32 %v1976_v4  ;;  %2148 = vmatmul.mubr.f32.gmra.mxu0 %v2872_v34 }
 0x696   : > { %v2876_v31 = vpop.eup %2875  ;;  %2889 = vpow2.f32 %v1978_v51 }
 0x697   : > { %v2878_v18 = vpop.eup %2877 }
 0x698   : > { %2152 = vmatprep.mubr.f32.mxu0 %v2878_v18  ;;  %v2016_v12 = vadd.f32 %v2878_v18, %v2876_v31 }
 0x699   : > { %2153 = vmatmul.mubr.f32.gmra.mxu0 %v2876_v31 }
 0x69a   : > { %v2880_v16 = vpop.eup %2879 }
 0x69b   : > { %v2882_v24 = vpop.eup %2881 }
 0x69c   : > { %2157 = vmatprep.mubr.f32.mxu0 %v2882_v24  ;;  %v2019_v36 = vadd.f32 %v2882_v24, %v2880_v16 }
 0x69d   : > { %2158 = vmatmul.mubr.f32.gmra.mxu0 %v2880_v16 }
 0x69e   : > { %v2884_v57 = vpop.eup %2883 }
 0x69f   : > { %v2886_v42 = vpop.eup %2885 }
 0x6a0   : > { %2162 = vmatprep.mubr.f32.mxu0 %v2886_v42  ;;  %v2022_v44 = vadd.f32 %v2886_v42, %v2884_v57 }
 0x6a1   : > { %2163 = vmatmul.mubr.f32.gmra.mxu0 %v2884_v57 }
 0x6a2   : > { %v2888_v27 = vpop.eup %2887 }
 0x6a3   : > { %v2890_v48 = vpop.eup %2889 }
 0x6a4   : > { %2167 = vmatprep.mubr.f32.mxu0 %v2890_v48  ;;  %v2025_v32 = vadd.f32 %v2890_v48, %v2888_v27 }
 0x6a5   : > { %2168 = vmatmul.mubr.f32.gmra.mxu0 %v2888_v27 }
 0x6a6   : > { %2026 = vadd.xlane.f32.xlu1 %v2025_v32 }
 0x6aa   : > { %2023 = vadd.xlane.f32.xlu1 %v2022_v44 }
 0x6ae   : > { %2020 = vadd.xlane.f32.xlu1 %v2019_v36 }
 0x6b2   : > { %2017 = vadd.xlane.f32.xlu1 %v2016_v12 }
 0x6b6   : > { %2014 = vadd.xlane.f32.xlu1 %v2013_v33 }
 0x6ba   : > { %2011 = vadd.xlane.f32.xlu1 %v2010_v7 }
 0x6be   : > { %2008 = vadd.xlane.f32.xlu1 %v2007_v14 }
 0x6c2   : > { %2005 = vadd.xlane.f32.xlu1 %v3792_v63 }
 0x6c6   : > { %2002 = vadd.xlane.f32.xlu1 %v3788_v61 }
 0x6ca   : > { %1999 = vadd.xlane.f32.xlu1 %v3784_v3 }
 0x6ce   : > { %1996 = vadd.xlane.f32.xlu1 %v3780_v21 }
 0x6d2   : > { %1993 = vadd.xlane.f32.xlu1 %v3776_v49 }
 0x6d6   : > { %1990 = vadd.xlane.f32.xlu1 %v3772_v35 }
 0x6da   : > { %1987 = vadd.xlane.f32.xlu1 %v3768_v6 }
 0x6de   : > { %1984 = vadd.xlane.f32.xlu1 %v3764_v17 }
 0x6e2   : > { %1981 = vadd.xlane.f32.xlu1 %v3760_v25 }
 0x6f3   : > { %1256 = vperm.xlu1 %2728, %v283_v37  }
 0x729   : > { %v3812_v62 = vpop.f32.mrf.mxu0 }
 0x72b   : > { %v2096_v11 = vpop.f32.mrf.mxu0 }
 0x72d   : > { %v3814_v59 = vpop.f32.mrf.mxu0 }
 0x72f   : > { %v2101_v21 = vpop.f32.mrf.mxu0  ;;  %v2027_v49 = vpop.xlane.xlu1 %2026 }
 0x730   : > { %2891 = vrcp.f32 %v2027_v49 }
 0x731   : > { %v3816_v3 = vpop.f32.mrf.mxu0 }
 0x733   : > { %v2106_v35 = vpop.f32.mrf.mxu0  ;;  %v2024_v6 = vpop.xlane.xlu1 %2023 }
 0x734   : > { %2893 = vrcp.f32 %v2024_v6 }
 0x735   : > { %v3818_v56 = vpop.f32.mrf.mxu0 }
 0x737   : > { %v2111_v17 = vpop.f32.mrf.mxu0  ;;  %v2021_v25 = vpop.xlane.xlu1 %2020 }
 0x738   : > { %2895 = vrcp.f32 %v2021_v25 }
 0x739   : > { %v3820_v29 = vpop.f32.mrf.mxu0 }
 0x73b   : > { %v2116_v55 = vpop.f32.mrf.mxu0  ;;  %v2018_v23 = vpop.xlane.xlu1 %2017 }
 0x73c   : > { %2897 = vrcp.f32 %v2018_v23 }
 0x73d   : > { %v3822_v1 = vpop.f32.mrf.mxu0  ;;  %v2892_v9 = vpop.eup %2891 }
 0x73e   : > { %v2204_v54 = vmul.f32 %v2892_v9, %v2027_v49 }
 0x73f   : > { %v2121_v41 = vpop.f32.mrf.mxu0  ;;  %v2015_v8 = vpop.xlane.xlu1 %2014 }
 0x740   : > { %2899 = vrcp.f32 %v2015_v8  ;;  %v2220_v4 = vsub.f32 2.0, %v2204_v54 }
 0x741   : > { %v3824_v61 = vpop.f32.mrf.mxu0  ;;  %v2894_v13 = vpop.eup %2893 }
 0x742   : > { %v2203_v51 = vmul.f32 %v2894_v13, %v2024_v6  ;;  %v2236_v27 = vmul.f32 %v2892_v9, %v2220_v4 }
 0x743   : > { %v2126_v15 = vpop.f32.mrf.mxu0  ;;  %v2012_v5 = vpop.xlane.xlu1 %2011 }
 0x744   : > { %2901 = vrcp.f32 %v2012_v5  ;;  %v2219_v57 = vsub.f32 2.0, %v2203_v51 }
 0x745   : > { %v3826_v46 = vpop.f32.mrf.mxu0  ;;  %v2896_v31 = vpop.eup %2895 }
 0x746   : > { %v2202_v42 = vmul.f32 %v2896_v31, %v2021_v25  ;;  %v2235_v14 = vmul.f32 %v2894_v13, %v2219_v57 }
 0x747   : > { %v2131_v60 = vpop.f32.mrf.mxu0  ;;  %v3828_v20 = vpop.xlane.xlu1 %2008 }
 0x748   : > { %2903 = vrcp.f32 %v3828_v20  ;;  %v2218_v33 = vsub.f32 2.0, %v2202_v42 }
 0x749   : > { %v3830_v28 = vpop.f32.mrf.mxu0  ;;  %v2898_v48 = vpop.eup %2897 }
 0x74a   : > { %v2201_v7 = vmul.f32 %v2898_v48, %v2018_v23  ;;  %v2234_v17 = vmul.f32 %v2896_v31, %v2218_v33 }
 0x74b   : > { %v2136_v52 = vpop.f32.mrf.mxu0  ;;  %v3832_v63 = vpop.xlane.xlu1 %2005 }
 0x74c   : > { %2905 = vrcp.f32 %v3832_v63  ;;  %v2217_v35 = vsub.f32 2.0, %v2201_v7 }
 0x74d   : > { %v3834_v10 = vpop.f32.mrf.mxu0  ;;  %v2900_v37 = vpop.eup %2899 }
 0x74e   : > { %v2200_v6 = vmul.f32 %v2900_v37, %v2015_v8  ;;  %v2233_v60 = vmul.f32 %v2898_v48, %v2217_v35 }
 0x74f   : > { %v2141_v38 = vpop.f32.mrf.mxu0  ;;  %v3836_v22 = vpop.xlane.xlu1 %2002 }
 0x750   : > { %2907 = vrcp.f32 %v3836_v22  ;;  %v2216_v15 = vsub.f32 2.0, %v2200_v6 }
 0x751   : > { %v3838_v45 = vpop.f32.mrf.mxu0  ;;  %v2902_v11 = vpop.eup %2901 }
 0x752   : > { %v2199_v25 = vmul.f32 %v2902_v11, %v2012_v5 }
 0x753   : > { %v2146_v0 = vpop.f32.mrf.mxu0  ;;  %v3840_v43 = vpop.xlane.xlu1 %1999 }
 0x754   : > { %2909 = vrcp.f32 %v3840_v43  ;;  %v2215_v52 = vsub.f32 2.0, %v2199_v25  ;;  %v2931_v0 = vld [vmem:[%s3110_s29] sm:$0xf] }
 0x755   : > { %v3842_v39 = vpop.f32.mrf.mxu0  ;;  %v2904_v23 = vpop.eup %2903 }
 0x756   : > { %v2198_v5 = vmul.f32 %v2904_v23, %v3828_v20 }
 0x757   : > { %v2151_v50 = vpop.f32.mrf.mxu0  ;;  %v3844_v58 = vpop.xlane.xlu1 %1996 }
 0x758   : > { %2911 = vrcp.f32 %v3844_v58  ;;  %v2214_v13 = vsub.f32 2.0, %v2198_v5 }
 0x759   : > { %v2154_v26 = vpop.f32.mrf.mxu0  ;;  %v2906_v9 = vpop.eup %2905 }
 0x75a   : > { %v2249_v38 = vmul.f32 %v2233_v60, %v2154_v26  ;;  %v2197_v20 = vmul.f32 %v2906_v9, %v3832_v63  ;;  %v2230_v4 = vmul.f32 %v2904_v23, %v2214_v13  ;;  %v2933_v60 = vld [vmem:[%s3110_s29 + $0x8] sm:$0xf] }
 0x75b   : > { %v2156_v30 = vpop.f32.mrf.mxu0  ;;  %v3846_v53 = vpop.xlane.xlu1 %1993 }
 0x75c   : > { %v2232_v30 = vmul.f32 %v2900_v37, %v2216_v15  ;;  %2913 = vrcp.f32 %v3846_v53 }
 0x75d   : > { %v2159_v19 = vpop.f32.mrf.mxu0  ;;  %v2908_v54 = vpop.eup %2907 }
 0x75e   : > { %v2250_v55 = vmul.f32 %v2234_v17, %v2159_v19  ;;  %v2248_v19 = vmul.f32 %v2232_v30, %v3842_v39  ;;  %v2196_v26 = vmul.f32 %v2908_v54, %v3836_v22 }
 0x75f   : > { %v2161_v34 = vpop.f32.mrf.mxu0  ;;  %v3848_v40 = vpop.xlane.xlu1 %1990 }
 0x760   : > { %v2213_v34 = vsub.f32 2.0, %v2197_v20  ;;  %2915 = vrcp.f32 %v3848_v40  ;;  %v2212_v63 = vsub.f32 2.0, %v2196_v26 }
 0x761   : > { %v2164_v18 = vpop.f32.mrf.mxu0  ;;  %v2910_v31 = vpop.eup %2909 }
 0x762   : > { %v2251_v21 = vmul.f32 %v2235_v14, %v2164_v18  ;;  %v2229_v39 = vmul.f32 %v2906_v9, %v2213_v34  ;;  %v2246_v18 = vmul.f32 %v2230_v4, %v3834_v10  ;;  %v2228_v57 = vmul.f32 %v2908_v54, %v2212_v63 }
 0x763   : > { %v2166_v16 = vpop.f32.mrf.mxu0  ;;  %v3851_v24 = vpop.xlane.xlu1 %1987 }
 0x764   : > { %v2195_v16 = vmul.f32 %v2910_v31, %v3840_v43  ;;  %2917 = vrcp.f32 %v3851_v24  ;;  %v2244_v10 = vmul.f32 %v2228_v57, %v3826_v46 }
 0x765   : > { %v2169_v32 = vpop.f32.mrf.mxu0  ;;  %v2912_v22 = vpop.eup %2911 }
 0x766   : > { %v2252_v44 = vmul.f32 %v2236_v27, %v2169_v32  ;;  %v2211_v42 = vsub.f32 2.0, %v2195_v16  ;;  %v2194_v27 = vmul.f32 %v2912_v22, %v3844_v58 }
 0x767   : > { %v2171_v36 = vpop.f32.mrf.mxu0  ;;  %v3854_v12 = vpop.xlane.xlu1 %1984 }
 0x768   : > { %2648 = vmatpush3.xpose.msk.msra.mxu1 %vm627_vm2, %v2252_v44  ;;  %2919 = vrcp.f32 %v3854_v12  ;;  %v2227_v43 = vmul.f32 %v2910_v31, %v2211_v42  ;;  %v2210_v32 = vsub.f32 2.0, %v2194_v27 }
 0x769   : > { %2649 = vmatprep.subr.mxu1 %v2996_v2  ;;  %v2914_v48 = vpop.eup %2913 }
 0x76a   : > { %v2193_v44 = vmul.f32 %v2914_v48, %v3846_v53  ;;  %v2226_v58 = vmul.f32 %v2912_v22, %v2210_v32 }
 0x76b   : > { %v3859_v49 = vpop.xlane.xlu1 %1981 }
 0x76c   : > { %2650 = vmatpush3.xpose.msk.msra.mxu1 %vm627_vm2, %v2251_v21  ;;  %2921 = vrcp.f32 %v3859_v49  ;;  %v2209_v33 = vsub.f32 2.0, %v2193_v44  ;;  %v2242_v53 = vmul.f32 %v2226_v58, %v3822_v1 }
 0x76d   : > { %2651 = vmatprep.subr.mxu1 %v2996_v2  ;;  %v2916_v36 = vpop.eup %2915 }
 0x76e   : > { %v2192_v7 = vmul.f32 %v2916_v36, %v3848_v40  ;;  %v2225_v14 = vmul.f32 %v2914_v48, %v2209_v33 }
 0x76f   : > { %v3867_v41 = vpop.permute.xlu1 %1256 }
 0x770   : > { %v1377_v8 = vadd.f32 %v3602_v47, %v3867_v41  ;;  %2652 = vmatpush3.xpose.msk.msra.mxu1 %vm627_vm2, %v2250_v55  ;;  %v2231_v47 = vmul.f32 %v2902_v11, %v2215_v52  ;;  %v2208_v37 = vsub.f32 2.0, %v2192_v7 }
 0x771   : > { %2653 = vmatprep.subr.mxu1 %v2996_v2  ;;  %v2918_v46 = vpop.eup %2917 }
 0x772   : > { %v1380_v50 = vadd.f32 %v2931_v0, %v1377_v8  ;;  %v2247_v51 = vmul.f32 %v2231_v47, %v3838_v45  ;;  %v2245_v45 = vmul.f32 %v2229_v39, %v3830_v28  ;;  %v2243_v28 = vmul.f32 %v2227_v43, %v3824_v61 }
 0x773   : > { %v2191_v11 = vmul.f32 %v2918_v46, %v3851_v24  ;;  %v2241_v61 = vmul.f32 %v2225_v14, %v3820_v29  ;;  %v2224_v35 = vmul.f32 %v2916_v36, %v2208_v37 }
 0x774   : > { %1381 = vst [vmem:[%s3876_s14] sm:$0xf] %v1380_v50  ;;  %2654 = vmatpush3.xpose.msk.msra.mxu1 %vm627_vm2, %v2249_v38 }
 0x775   : > { %2655 = vmatprep.subr.mxu1 %v2996_v2  ;;  %v2920_v21 = vpop.eup %2919  ;;  %v2207_v40 = vsub.f32 2.0, %v2191_v11  ;;  %v2240_v1 = vmul.f32 %v2224_v35, %v3818_v56 }
 0x776   : > { %v2190_v6 = vmul.f32 %v2920_v21, %v3854_v12 }
 0x777   : > { %v2223_v25 = vmul.f32 %v2918_v46, %v2207_v40 }
 0x778   : > { %2656 = vmatpush3.xpose.msk.msra.mxu1 %vm627_vm2, %v2248_v19  ;;  %v2206_v24 = vsub.f32 2.0, %v2190_v6 }
 0x779   : > { %2657 = vmatprep.subr.mxu1 %v2996_v2  ;;  %v2922_v17 = vpop.eup %2921  ;;  %v2239_v29 = vmul.f32 %v2223_v25, %v3816_v3  ;;  %v2932_v3 = vld [vmem:[%s3993_s5] sm:$0xf] }
 0x77a   : > { %v2189_v55 = vmul.f32 %v2922_v17, %v3859_v49  ;;  %v2222_v12 = vmul.f32 %v2920_v21, %v2206_v24 }
 0x77c   : > { %2658 = vmatpush3.xpose.msk.msra.mxu1 %vm627_vm2, %v2247_v51  ;;  %v2205_v23 = vsub.f32 2.0, %v2189_v55  ;;  %v2238_v56 = vmul.f32 %v2222_v12, %v3814_v59 }
 0x77d   : > { %2659 = vmatprep.subr.mxu1 %v2996_v2 }
 0x77e   : > { %v2221_v15 = vmul.f32 %v2922_v17, %v2205_v23 }
 0x780   : > { %2660 = vmatpush3.xpose.msk.msra.mxu1 %vm627_vm2, %v2246_v18  ;;  %v2237_v49 = vmul.f32 %v2221_v15, %v3812_v62 }
 0x781   : > { %2661 = vmatprep.subr.mxu1 %v2996_v2 }
 0x784   : > { %2662 = vmatpush3.xpose.msk.msra.mxu1 %vm627_vm2, %v2245_v45 }
 0x785   : > { %2663 = vmatprep.subr.mxu1 %v2996_v2 }
 0x788   : > { %2664 = vmatpush3.xpose.msk.msra.mxu1 %vm627_vm2, %v2244_v10 }
 0x789   : > { %2665 = vmatprep.subr.mxu1 %v2996_v2 }
 0x78c   : > { %2666 = vmatpush3.xpose.msk.msra.mxu1 %vm627_vm2, %v2243_v28 }
 0x78d   : > { %2667 = vmatprep.subr.mxu1 %v2996_v2 }
 0x790   : > { %2668 = vmatpush3.xpose.msk.msra.mxu1 %vm627_vm2, %v2242_v53 }
 0x791   : > { %2669 = vmatprep.subr.mxu1 %v2996_v2 }
 0x794   : > { %2670 = vmatpush3.xpose.msk.msra.mxu1 %vm627_vm2, %v2241_v61 }
 0x795   : > { %2671 = vmatprep.subr.mxu1 %v2996_v2 }
 0x798   : > { %2672 = vmatpush3.xpose.msk.msra.mxu1 %vm627_vm2, %v2240_v1 }
 0x799   : > { %2673 = vmatprep.subr.mxu1 %v2996_v2 }
 0x79c   : > { %2674 = vmatpush3.xpose.msk.msra.mxu1 %vm627_vm2, %v2239_v29 }
 0x79d   : > { %2675 = vmatprep.subr.mxu1 %v2996_v2 }
 0x7a0   : > { %2676 = vmatpush3.xpose.msk.msra.mxu1 %vm627_vm2, %v2238_v56 }
 0x7a1   : > { %2677 = vmatprep.subr.mxu1 %v2996_v2 }
 0x7a4   : > { %2678 = vmatpush3.xpose.msk.msra.mxu1 %vm627_vm2, %v2237_v49 }
 0x7a7   : > { %2680 = vmatmul.mubr.msk.f32.vlgmr.msra.gmra.mxu1 %vm627_vm2, %v2932_v3 }
 0x867   : > { %v2367_v59 = vpop.f32.mrf.mxu1 }
 0x868   : > { %v2368_v2 = vadd.f32 %v2367_v59, %v3867_v41 }
 0x869   : > { %v2681_v62 = vpop.f32.mrf.mxu1 }
 0x86a   : > { %v2371_v8 = vadd.f32 %v2933_v60, %v2368_v2 }
 0x86c   : > { %2547 = vst [vmem:[%s3876_s14 + $0x4] sm:$0xf] %v2371_v8 }
 0x86d   : > { %2947 = shalt.err (!%p2944_p2)
}
 0x86e   : > { %s2948_s29 = scalar_lea.hbm %s3942_s21, 128  ;;  %s2952_s15 = scalar_lea.hbm %s3995_s7, 256 }
 0x86f   : > { %p2949_p3 = scmp.ne.s32.totalorder %s3942_s21, %s2948_s29  ;;  %p2953_p8 = scmp.lt.s32.totalorder %s3942_s21, %s3995_s7 }
 0x870   : > { %p2954_p9 = scmp.lt.s32.totalorder %s2952_s15, %s2948_s29 }
 0x871   : > { %p2950_p4 = pnand %p2949_p3, %p3081_p5 }
 0x872   : > { %p2955_p10 = por %p2954_p9, %p2953_p8 }
 0x873   : > { %p2951_p7 = pneg %p2950_p4 }
 0x875   : > { %p2956_p11 = pnand %p2955_p10, %p2951_p7 }
 0x877   : > { %2959 = shalt.err (!%p2956_p11)
}
 0x878   : > { %s3000_s19 = smov 64   ;;  %s3001_s20 = smov 128  }
 0x879   : > { %s3002_s28 = smov 4  }
 0x87a   : > { %2682 = dma.vmem_to_hbm [thread:$0]  (%p3081_p5), %s3936_s17, 128, %s3942_s21, %s3948_s22, %s3000_s19, %s3001_s20, %s3002_s28  }
 0x87b PF: > { %p2688_p12 = scmp.ge.s32.totalorder %s2994_s27, 2  ;;  %s2402_s23 = sand.u32 1, %s2982_s24  }
 0x87c   : > { %s2403_s8 = scalar_lea.sflag [#allocation3], %s2402_s23 }
 0x87d   : > { %p2685_p13 = pnand %p2688_p12, %p3085_p6 }
 0x87f   : > { %p2686_p0 = pneg %p2685_p13 }
 0x881   : > { %2977 = dma.done.wait (%p2686_p0), %s2403_s8, 128  }
 0x882   : > { %2979 = vsyncadd (%p2686_p0), %s2403_s8, 4294967168  ;;  %p17_p1 = scmp.ge.s32.totalorder %s3068_s30, 4   ;;  %s3998_s24 = smov %s2986_s25 }
 0x883   : > { %s3999_s25 = smov %s2990_s26  ;;  %s4000_s26 = smov %s3079_s10 }
 0x884   : > { %s4001_s27 = smov %s3068_s30  ;;  %19 = sbr.rel (!%p17_p1) target bundleno = 3 (0x3), region = 84 }
 0x889   :  { %2408 = vsyncpa [#allocation3], 1 }
 0x88a   :  { %2410 = vsyncpa [#allocation3 + $0x1], 1 }

</bundles_post_ra>
